<compile_context>
chip_gen: v5e
topology: v5e:2x2
jax: 0.10.0
libtpu: 0.0.40
codegen_flags: <defaults>
</compile_context>

<pallas_src>
import math

import jax
import jax.numpy as jnp
from jax.experimental import pallas as pl
from jax.experimental.pallas import tpu as pltpu


def gcn_classifier_kernel(d_ref, x_ref, w1t_ref, b1_ref, w2t_ref, b2_ref, o_ref):
    """One grid step = `bb` whole graphs, node-major layout (nodes on sublanes).

    d_ref   : [bbN, 2N-1] f32  diagonals of blockdiag(A_1..A_bb); column e+(N-1),
                               row r holds the coefficient coupling source node r
                               to destination node r+e (0 across graph boundaries
                               and at array edges).
    x_ref   : [bbN, Din]  f32  node features (natural layout, no transpose).
    w1t_ref : [Din, H]    f32  gcn1.linear.weight^T
    b1_ref  : [1, H]      f32  gcn1.linear.bias
    w2t_ref : [H, Dout]   f32  gcn2.linear.weight^T
    b2_ref  : [1, Dout]   f32  gcn2.linear.bias
    o_ref   : [bbN, Dout] f32  logits, written directly in node-major layout.
    """
    d = d_ref[...]
    half = (d.shape[1] - 1) // 2            # = N - 1

    def apply_adj(v):
        # blockdiag(A) @ v as a banded operator:
        #   out[r] = sum_e A_bd[r, r-e] * v[r-e] = sum_e roll(diag_e * v, e, axis=0)[r]
        # Wrapped-around roll terms are killed by the zeros the wrapper places
        # at block/array edges, so plain rolls are exact.
        out = d[:, half:half + 1] * v                                        # e = 0
        for e in range(1, half + 1):
            out = out + jnp.roll(d[:, half + e:half + e + 1] * v, e, axis=0)
            out = out + jnp.roll(d[:, half - e:half - e + 1] * v, -e, axis=0)
        return out

    x = x_ref[...]                                                            # [bbN, Din]
    s1 = apply_adj(x)                                                         # A @ X
    h1 = jnp.maximum(
        jnp.dot(s1, w1t_ref[...], preferred_element_type=jnp.float32) + b1_ref[...],
        0.0,
    )                                                                         # [bbN, H]
    # Layer 2 reassociated:  A @ (h1 @ W2^T)  ==  (A @ h1) @ W2^T
    p2 = jnp.dot(h1, w2t_ref[...], preferred_element_type=jnp.float32)        # [bbN, Dout]
    o_ref[...] = (apply_adj(p2) + b2_ref[...]).astype(o_ref.dtype)


def _pick_graphs_per_step(batch, n_nodes, target_nodes_per_step=512):
    """Pick graphs-per-grid-step `bb`.

    * bb*N ~ 512 nodes: amortizes per-grid-step overhead while staying far
      inside the VMEM budgets of v5e (16 MiB scoped default), v6e and v7x.
    * bb is a multiple of `unit` so bb*N is sublane-aligned (multiple of 8).
    * If everything would fit in one grid step but can be split into two
      >=128-node steps, split so the "parallel" axis can use both v7x cores.
    """
    unit = 8 // math.gcd(n_nodes, 8)
    bb = max(unit, (max(1, target_nodes_per_step // n_nodes) // unit) * unit)
    batch_padded = -(-batch // unit) * unit
    bb = min(bb, batch_padded)
    if batch_padded <= bb:                           # would be a single grid step
        half = ((bb // 2) // unit) * unit
        if half > 0 and half * n_nodes >= 128:
            bb = half
    return bb


def _banded_adjacency(adjacency):
    """[B, N, N] -> [B*N, 2N-1] diagonals of blockdiag(A_1..A_B).

    Column (e + N - 1), row b*N + j holds A[b, j+e, j] (destination = source + e),
    and 0 where j+e falls outside [0, N), so in-kernel rolls never leak across
    graph or grid-step boundaries.
    """
    B, N, _ = adjacency.shape
    offs = jnp.arange(-(N - 1), N)                   # [2N-1]
    j = jnp.arange(N)
    i = j[None, :] + offs[:, None]                   # [2N-1, N]
    valid = (i >= 0) & (i < N)
    i_c = jnp.clip(i, 0, N - 1)
    diag = adjacency[:, i_c, j[None, :]]             # [B, 2N-1, N] = A[b, j+e, j]
    diag = jnp.where(valid[None, :, :], diag, 0.0)
    return jnp.transpose(diag, (0, 2, 1)).reshape(B * N, 2 * N - 1)


def gcn_classifier_forward(adjacency, node_features, w1, b1, w2, b2, *, graphs_per_step=None):
    """Batched GCNClassifier forward.

    adjacency     : [B, N, N] or [N, N]
    node_features : [B, N, Din] or [N, Din]
    w1, b1, w2, b2: nn.Linear parameters ([H, Din], [H], [Dout, H], [Dout])
    returns       : [B, N, Dout] (or [N, Dout] for a single graph)
    """
    single = adjacency.ndim == 2
    if single:
        adjacency = adjacency[None]
        node_features = node_features[None]

    adjacency = jnp.asarray(adjacency, jnp.float32)
    node_features = jnp.asarray(node_features, jnp.float32)
    B, N, _ = adjacency.shape
    Din = node_features.shape[-1]
    H = w1.shape[0]
    Dout = w2.shape[0]

    unit = 8 // math.gcd(N, 8)
    if graphs_per_step is None:
        bb = _pick_graphs_per_step(B, N)
    else:
        bb = max(unit, -(-int(graphs_per_step) // unit) * unit)
    n_steps = -(-B // bb)
    B_pad = n_steps * bb
    if B_pad != B:
        pad = B_pad - B
        adjacency = jnp.pad(adjacency, ((0, pad), (0, 0), (0, 0)))
        node_features = jnp.pad(node_features, ((0, pad), (0, 0), (0, 0)))
    bbN = bb * N
    nd = 2 * N - 1

    # ---- wrapper-side prep: O(B*N*N), no bb-x inflation, no big transposes ----
    diag = _banded_adjacency(adjacency)                       # [B_pad*N, 2N-1]
    x2d = node_features.reshape(B_pad * N, Din)               # free reshape, no transpose
    w1t = jnp.asarray(w1, jnp.float32).T                      # [Din, H]   (tiny, one-time)
    w2t = jnp.asarray(w2, jnp.float32).T                      # [H, Dout]  (tiny, one-time)
    b1r = jnp.asarray(b1, jnp.float32).reshape(1, H)
    b2r = jnp.asarray(b2, jnp.float32).reshape(1, Dout)

    total_nodes = B_pad * N
    flops = 2 * total_nodes * (nd * Din + Din * H + H * Dout + nd * Dout)
    bytes_accessed = 4 * (total_nodes * (nd + Din + Dout)
                          + Din * H + H + H * Dout + Dout)

    out2d = pl.pallas_call(
        gcn_classifier_kernel,
        out_shape=jax.ShapeDtypeStruct((total_nodes, Dout), jnp.float32),
        grid_spec=pltpu.PrefetchScalarGridSpec(
            num_scalar_prefetch=0,
            grid=(n_steps,),
            in_specs=[
                # TODO(synk): if a trace shows exposed DMA at very large B, try
                # pipeline_mode=pl.Buffered(3) on the two per-step inputs.
                pl.BlockSpec((bbN, nd), lambda g: (g, 0)),     # banded adjacency (per step)
                pl.BlockSpec((bbN, Din), lambda g: (g, 0)),    # features         (per step)
                pl.BlockSpec((Din, H), lambda g: (0, 0)),      # W1^T (resident)
                pl.BlockSpec((1, H), lambda g: (0, 0)),        # b1
                pl.BlockSpec((H, Dout), lambda g: (0, 0)),     # W2^T
                pl.BlockSpec((1, Dout), lambda g: (0, 0)),     # b2
            ],
            out_specs=pl.BlockSpec((bbN, Dout), lambda g: (g, 0)),
        ),
        compiler_params=pltpu.CompilerParams(
            dimension_semantics=("parallel",),        # shards steps across v7x's 2 TCs
            vmem_limit_bytes=32 * 1024 * 1024,        # >= scoped default everywhere, << physical
        ),
        cost_estimate=pl.CostEstimate(
            flops=flops, transcendentals=0, bytes_accessed=bytes_accessed),
    )(diag, x2d, w1t, b1r, w2t, b2r)

    out = out2d.reshape(B_pad, N, Dout)[:B]           # free reshape + slice, no transpose
    return out[0] if single else out


def gcn_classifier_ref(adjacency, node_features, w1, b1, w2, b2):
    """Pure-JAX reference mirroring the PyTorch module (single graph)."""
    s1 = adjacency @ node_features
    h1 = jax.nn.relu(s1 @ w1.T + b1)
    s2 = adjacency @ h1
    return s2 @ w2.T + b2


if __name__ == "__main__":
    N, INPUT_DIM, HIDDEN_DIM, OUTPUT_DIM = 4, 3, 32, 8
    B = 64   # -> 2 grid steps x 32 graphs/step (128 nodes per step)

    key = jax.random.PRNGKey(0)
    k_x, k_w1, k_b1, k_w2, k_b2 = jax.random.split(key, 5)

    adjacency = jnp.array(
        [[0, 1, 0, 0],
         [1, 0, 1, 0],
         [0, 1, 0, 1],
         [0, 0, 1, 0]],
        dtype=jnp.float32,
    )
    adj_batch = jnp.tile(adjacency[None], (B, 1, 1))                        # [B, N, N]
    feat_batch = jax.random.uniform(k_x, (B, N, INPUT_DIM), dtype=jnp.float32)

    # nn.Linear-shaped parameters: weight [out, in], bias [out].
    w1 = jax.random.normal(k_w1, (HIDDEN_DIM, INPUT_DIM), dtype=jnp.float32) * 0.1
    b1 = jax.random.normal(k_b1, (HIDDEN_DIM,), dtype=jnp.float32) * 0.1
    w2 = jax.random.normal(k_w2, (OUTPUT_DIM, HIDDEN_DIM), dtype=jnp.float32) * 0.1
    b2 = jax.random.normal(k_b2, (OUTPUT_DIM,), dtype=jnp.float32) * 0.1

    # Batched run (the intended fast path).
    out = gcn_classifier_forward(adj_batch, feat_batch, w1, b1, w2, b2)
    out = jax.block_until_ready(out)

    ref = jax.vmap(lambda a, x: gcn_classifier_ref(a, x, w1, b1, w2, b2))(adj_batch, feat_batch)
    assert out.shape == (B, N, OUTPUT_DIM)
    assert jnp.allclose(out, ref, atol=1e-4, rtol=1e-4), "Pallas kernel mismatch vs reference (batched)"

    # Original single-graph API of the PyTorch module still works.
    out_single = gcn_classifier_forward(adjacency, feat_batch[0], w1, b1, w2, b2)
    out_single = jax.block_until_ready(out_single)
    assert out_single.shape == (N, OUTPUT_DIM)
    assert jnp.allclose(out_single, ref[0], atol=1e-4, rtol=1e-4), "Pallas kernel mismatch vs reference (single)"

    print("KERNEL_OK")
</pallas_src>

<mosaic_0001>
module attributes {stable_mosaic.version = 11 : i64} {
  func.func @gcn_classifier_kernel(%arg0: i32, %arg1: memref<128x7xf32, #tpu.memory_space<vmem>>, %arg2: memref<128x3xf32, #tpu.memory_space<vmem>>, %arg3: memref<3x32xf32, #tpu.memory_space<vmem>>, %arg4: memref<1x32xf32, #tpu.memory_space<vmem>>, %arg5: memref<32x8xf32, #tpu.memory_space<vmem>>, %arg6: memref<1x8xf32, #tpu.memory_space<vmem>>, %arg7: memref<128x8xf32, #tpu.memory_space<vmem>>) attributes {dimension_semantics = [#tpu.dimension_semantics<parallel>], iteration_bounds = array<i64: 2>, scalar_prefetch = 0 : i64, scratch_operands = 0 : i64, tpu.core_type = #tpu.core_type<tc>, window_params = [{transform_indices = @transform_0, window_bounds = array<i64: 128, 7>}, {transform_indices = @transform_1, window_bounds = array<i64: 128, 3>}, {pipeline_mode = #tpu.pipeline_mode<synchronous>, transform_indices = @transform_2, window_bounds = array<i64: 3, 32>}, {pipeline_mode = #tpu.pipeline_mode<synchronous>, transform_indices = @transform_3, window_bounds = array<i64: 1, 32>}, {pipeline_mode = #tpu.pipeline_mode<synchronous>, transform_indices = @transform_4, window_bounds = array<i64: 32, 8>}, {pipeline_mode = #tpu.pipeline_mode<synchronous>, transform_indices = @transform_5, window_bounds = array<i64: 1, 8>}, {transform_indices = @transform_6, window_bounds = array<i64: 128, 8>}]} {
    %c0 = arith.constant 0 : index
    %c0_0 = arith.constant 0 : index
    %0 = vector.load %arg1[%c0, %c0_0] : memref<128x7xf32, #tpu.memory_space<vmem>>, vector<128x7xf32>
    %c0_1 = arith.constant 0 : index
    %c0_2 = arith.constant 0 : index
    %1 = vector.load %arg2[%c0_1, %c0_2] : memref<128x3xf32, #tpu.memory_space<vmem>>, vector<128x3xf32>
    %2 = vector.extract_strided_slice %0 {offsets = [0, 3], sizes = [128, 1], strides = [1, 1]} : vector<128x7xf32> to vector<128x1xf32>
    %3 = vector.broadcast %2 : vector<128x1xf32> to vector<128x3xf32>
    %4 = arith.mulf %3, %1 : vector<128x3xf32>
    %5 = vector.extract_strided_slice %0 {offsets = [0, 4], sizes = [128, 1], strides = [1, 1]} : vector<128x7xf32> to vector<128x1xf32>
    %6 = vector.broadcast %5 : vector<128x1xf32> to vector<128x3xf32>
    %7 = arith.mulf %6, %1 : vector<128x3xf32>
    %8 = vector.extract_strided_slice %7 {offsets = [127, 0], sizes = [1, 3], strides = [1, 1]} : vector<128x3xf32> to vector<1x3xf32>
    %9 = vector.extract_strided_slice %7 {offsets = [0, 0], sizes = [127, 3], strides = [1, 1]} : vector<128x3xf32> to vector<127x3xf32>
    %10 = tpu.concatenate %8, %9 in 0 : vector<1x3xf32>, vector<127x3xf32> -> vector<128x3xf32>
    %11 = arith.addf %4, %10 : vector<128x3xf32>
    %12 = vector.extract_strided_slice %0 {offsets = [0, 2], sizes = [128, 1], strides = [1, 1]} : vector<128x7xf32> to vector<128x1xf32>
    %13 = vector.broadcast %12 : vector<128x1xf32> to vector<128x3xf32>
    %14 = arith.mulf %13, %1 : vector<128x3xf32>
    %15 = vector.extract_strided_slice %14 {offsets = [1, 0], sizes = [127, 3], strides = [1, 1]} : vector<128x3xf32> to vector<127x3xf32>
    %16 = vector.extract_strided_slice %14 {offsets = [0, 0], sizes = [1, 3], strides = [1, 1]} : vector<128x3xf32> to vector<1x3xf32>
    %17 = tpu.concatenate %15, %16 in 0 : vector<127x3xf32>, vector<1x3xf32> -> vector<128x3xf32>
    %18 = arith.addf %11, %17 : vector<128x3xf32>
    %19 = vector.extract_strided_slice %0 {offsets = [0, 5], sizes = [128, 1], strides = [1, 1]} : vector<128x7xf32> to vector<128x1xf32>
    %20 = vector.broadcast %19 : vector<128x1xf32> to vector<128x3xf32>
    %21 = arith.mulf %20, %1 : vector<128x3xf32>
    %22 = vector.extract_strided_slice %21 {offsets = [126, 0], sizes = [2, 3], strides = [1, 1]} : vector<128x3xf32> to vector<2x3xf32>
    %23 = vector.extract_strided_slice %21 {offsets = [0, 0], sizes = [126, 3], strides = [1, 1]} : vector<128x3xf32> to vector<126x3xf32>
    %24 = tpu.concatenate %22, %23 in 0 : vector<2x3xf32>, vector<126x3xf32> -> vector<128x3xf32>
    %25 = arith.addf %18, %24 : vector<128x3xf32>
    %26 = vector.extract_strided_slice %0 {offsets = [0, 1], sizes = [128, 1], strides = [1, 1]} : vector<128x7xf32> to vector<128x1xf32>
    %27 = vector.broadcast %26 : vector<128x1xf32> to vector<128x3xf32>
    %28 = arith.mulf %27, %1 : vector<128x3xf32>
    %29 = vector.extract_strided_slice %28 {offsets = [2, 0], sizes = [126, 3], strides = [1, 1]} : vector<128x3xf32> to vector<126x3xf32>
    %30 = vector.extract_strided_slice %28 {offsets = [0, 0], sizes = [2, 3], strides = [1, 1]} : vector<128x3xf32> to vector<2x3xf32>
    %31 = tpu.concatenate %29, %30 in 0 : vector<126x3xf32>, vector<2x3xf32> -> vector<128x3xf32>
    %32 = arith.addf %25, %31 : vector<128x3xf32>
    %33 = vector.extract_strided_slice %0 {offsets = [0, 6], sizes = [128, 1], strides = [1, 1]} : vector<128x7xf32> to vector<128x1xf32>
    %34 = vector.broadcast %33 : vector<128x1xf32> to vector<128x3xf32>
    %35 = arith.mulf %34, %1 : vector<128x3xf32>
    %36 = vector.extract_strided_slice %35 {offsets = [125, 0], sizes = [3, 3], strides = [1, 1]} : vector<128x3xf32> to vector<3x3xf32>
    %37 = vector.extract_strided_slice %35 {offsets = [0, 0], sizes = [125, 3], strides = [1, 1]} : vector<128x3xf32> to vector<125x3xf32>
    %38 = tpu.concatenate %36, %37 in 0 : vector<3x3xf32>, vector<125x3xf32> -> vector<128x3xf32>
    %39 = arith.addf %32, %38 : vector<128x3xf32>
    %40 = vector.extract_strided_slice %0 {offsets = [0, 0], sizes = [128, 1], strides = [1, 1]} : vector<128x7xf32> to vector<128x1xf32>
    %41 = vector.broadcast %40 : vector<128x1xf32> to vector<128x3xf32>
    %42 = arith.mulf %41, %1 : vector<128x3xf32>
    %43 = vector.extract_strided_slice %42 {offsets = [3, 0], sizes = [125, 3], strides = [1, 1]} : vector<128x3xf32> to vector<125x3xf32>
    %44 = vector.extract_strided_slice %42 {offsets = [0, 0], sizes = [3, 3], strides = [1, 1]} : vector<128x3xf32> to vector<3x3xf32>
    %45 = tpu.concatenate %43, %44 in 0 : vector<125x3xf32>, vector<3x3xf32> -> vector<128x3xf32>
    %46 = arith.addf %39, %45 : vector<128x3xf32>
    %c0_3 = arith.constant 0 : index
    %c0_4 = arith.constant 0 : index
    %47 = vector.load %arg3[%c0_3, %c0_4] : memref<3x32xf32, #tpu.memory_space<vmem>>, vector<3x32xf32>
    %cst = arith.constant dense<0.000000e+00> : vector<128x32xf32>
    %48 = tpu.matmul %46, %47, %cst {dimension_numbers = #tpu.dot_dimension_numbers<[1], [0], [0], [1], [0, 0, 1, 1], [], []>} : vector<128x3xf32>, vector<3x32xf32>, vector<128x32xf32> -> vector<128x32xf32>
    %c0_5 = arith.constant 0 : index
    %c0_6 = arith.constant 0 : index
    %49 = vector.load %arg4[%c0_5, %c0_6] : memref<1x32xf32, #tpu.memory_space<vmem>>, vector<1x32xf32>
    %50 = vector.broadcast %49 : vector<1x32xf32> to vector<128x32xf32>
    %51 = arith.addf %48, %50 : vector<128x32xf32>
    %cst_7 = arith.constant 0.000000e+00 : f32
    %52 = vector.broadcast %cst_7 : f32 to vector<128x32xf32>
    %53 = arith.maximumf %51, %52 : vector<128x32xf32>
    %c0_8 = arith.constant 0 : index
    %c0_9 = arith.constant 0 : index
    %54 = vector.load %arg5[%c0_8, %c0_9] : memref<32x8xf32, #tpu.memory_space<vmem>>, vector<32x8xf32>
    %cst_10 = arith.constant dense<0.000000e+00> : vector<128x8xf32>
    %55 = tpu.matmul %53, %54, %cst_10 {dimension_numbers = #tpu.dot_dimension_numbers<[1], [0], [0], [1], [0, 0, 1, 1], [], []>} : vector<128x32xf32>, vector<32x8xf32>, vector<128x8xf32> -> vector<128x8xf32>
    %56 = vector.extract_strided_slice %0 {offsets = [0, 3], sizes = [128, 1], strides = [1, 1]} : vector<128x7xf32> to vector<128x1xf32>
    %57 = vector.broadcast %56 : vector<128x1xf32> to vector<128x8xf32>
    %58 = arith.mulf %57, %55 : vector<128x8xf32>
    %59 = vector.extract_strided_slice %0 {offsets = [0, 4], sizes = [128, 1], strides = [1, 1]} : vector<128x7xf32> to vector<128x1xf32>
    %60 = vector.broadcast %59 : vector<128x1xf32> to vector<128x8xf32>
    %61 = arith.mulf %60, %55 : vector<128x8xf32>
    %62 = vector.extract_strided_slice %61 {offsets = [127, 0], sizes = [1, 8], strides = [1, 1]} : vector<128x8xf32> to vector<1x8xf32>
    %63 = vector.extract_strided_slice %61 {offsets = [0, 0], sizes = [127, 8], strides = [1, 1]} : vector<128x8xf32> to vector<127x8xf32>
    %64 = tpu.concatenate %62, %63 in 0 : vector<1x8xf32>, vector<127x8xf32> -> vector<128x8xf32>
    %65 = arith.addf %58, %64 : vector<128x8xf32>
    %66 = vector.extract_strided_slice %0 {offsets = [0, 2], sizes = [128, 1], strides = [1, 1]} : vector<128x7xf32> to vector<128x1xf32>
    %67 = vector.broadcast %66 : vector<128x1xf32> to vector<128x8xf32>
    %68 = arith.mulf %67, %55 : vector<128x8xf32>
    %69 = vector.extract_strided_slice %68 {offsets = [1, 0], sizes = [127, 8], strides = [1, 1]} : vector<128x8xf32> to vector<127x8xf32>
    %70 = vector.extract_strided_slice %68 {offsets = [0, 0], sizes = [1, 8], strides = [1, 1]} : vector<128x8xf32> to vector<1x8xf32>
    %71 = tpu.concatenate %69, %70 in 0 : vector<127x8xf32>, vector<1x8xf32> -> vector<128x8xf32>
    %72 = arith.addf %65, %71 : vector<128x8xf32>
    %73 = vector.extract_strided_slice %0 {offsets = [0, 5], sizes = [128, 1], strides = [1, 1]} : vector<128x7xf32> to vector<128x1xf32>
    %74 = vector.broadcast %73 : vector<128x1xf32> to vector<128x8xf32>
    %75 = arith.mulf %74, %55 : vector<128x8xf32>
    %76 = vector.extract_strided_slice %75 {offsets = [126, 0], sizes = [2, 8], strides = [1, 1]} : vector<128x8xf32> to vector<2x8xf32>
    %77 = vector.extract_strided_slice %75 {offsets = [0, 0], sizes = [126, 8], strides = [1, 1]} : vector<128x8xf32> to vector<126x8xf32>
    %78 = tpu.concatenate %76, %77 in 0 : vector<2x8xf32>, vector<126x8xf32> -> vector<128x8xf32>
    %79 = arith.addf %72, %78 : vector<128x8xf32>
    %80 = vector.extract_strided_slice %0 {offsets = [0, 1], sizes = [128, 1], strides = [1, 1]} : vector<128x7xf32> to vector<128x1xf32>
    %81 = vector.broadcast %80 : vector<128x1xf32> to vector<128x8xf32>
    %82 = arith.mulf %81, %55 : vector<128x8xf32>
    %83 = vector.extract_strided_slice %82 {offsets = [2, 0], sizes = [126, 8], strides = [1, 1]} : vector<128x8xf32> to vector<126x8xf32>
    %84 = vector.extract_strided_slice %82 {offsets = [0, 0], sizes = [2, 8], strides = [1, 1]} : vector<128x8xf32> to vector<2x8xf32>
    %85 = tpu.concatenate %83, %84 in 0 : vector<126x8xf32>, vector<2x8xf32> -> vector<128x8xf32>
    %86 = arith.addf %79, %85 : vector<128x8xf32>
    %87 = vector.extract_strided_slice %0 {offsets = [0, 6], sizes = [128, 1], strides = [1, 1]} : vector<128x7xf32> to vector<128x1xf32>
    %88 = vector.broadcast %87 : vector<128x1xf32> to vector<128x8xf32>
    %89 = arith.mulf %88, %55 : vector<128x8xf32>
    %90 = vector.extract_strided_slice %89 {offsets = [125, 0], sizes = [3, 8], strides = [1, 1]} : vector<128x8xf32> to vector<3x8xf32>
    %91 = vector.extract_strided_slice %89 {offsets = [0, 0], sizes = [125, 8], strides = [1, 1]} : vector<128x8xf32> to vector<125x8xf32>
    %92 = tpu.concatenate %90, %91 in 0 : vector<3x8xf32>, vector<125x8xf32> -> vector<128x8xf32>
    %93 = arith.addf %86, %92 : vector<128x8xf32>
    %94 = vector.extract_strided_slice %0 {offsets = [0, 0], sizes = [128, 1], strides = [1, 1]} : vector<128x7xf32> to vector<128x1xf32>
    %95 = vector.broadcast %94 : vector<128x1xf32> to vector<128x8xf32>
    %96 = arith.mulf %95, %55 : vector<128x8xf32>
    %97 = vector.extract_strided_slice %96 {offsets = [3, 0], sizes = [125, 8], strides = [1, 1]} : vector<128x8xf32> to vector<125x8xf32>
    %98 = vector.extract_strided_slice %96 {offsets = [0, 0], sizes = [3, 8], strides = [1, 1]} : vector<128x8xf32> to vector<3x8xf32>
    %99 = tpu.concatenate %97, %98 in 0 : vector<125x8xf32>, vector<3x8xf32> -> vector<128x8xf32>
    %100 = arith.addf %93, %99 : vector<128x8xf32>
    %c0_11 = arith.constant 0 : index
    %c0_12 = arith.constant 0 : index
    %101 = vector.load %arg6[%c0_11, %c0_12] : memref<1x8xf32, #tpu.memory_space<vmem>>, vector<1x8xf32>
    %102 = vector.broadcast %101 : vector<1x8xf32> to vector<128x8xf32>
    %103 = arith.addf %100, %102 : vector<128x8xf32>
    %c0_13 = arith.constant 0 : index
    %c0_14 = arith.constant 0 : index
    %104 = vector.load %arg7[%c0_13, %c0_14] : memref<128x8xf32, #tpu.memory_space<vmem>>, vector<128x8xf32>
    tpu.vector_store %arg7[%c0_13, %c0_14], %103 {strides = array<i32>} : memref<128x8xf32, #tpu.memory_space<vmem>>, vector<128x8xf32>,
    return
  }
  func.func @transform_0(%arg0: i32) -> (i32, i32) {
    %c0_i32 = arith.constant 0 : i32
    %c0_i32_0 = arith.constant 0 : i32
    return %arg0, %c0_i32 : i32, i32
  }
  func.func @transform_1(%arg0: i32) -> (i32, i32) {
    %c0_i32 = arith.constant 0 : i32
    %c0_i32_0 = arith.constant 0 : i32
    return %arg0, %c0_i32 : i32, i32
  }
  func.func @transform_2(%arg0: i32) -> (i32, i32) {
    %c0_i32 = arith.constant 0 : i32
    %c0_i32_0 = arith.constant 0 : i32
    %c0_i32_1 = arith.constant 0 : i32
    return %c0_i32, %c0_i32_0 : i32, i32
  }
  func.func @transform_3(%arg0: i32) -> (i32, i32) {
    %c0_i32 = arith.constant 0 : i32
    %c0_i32_0 = arith.constant 0 : i32
    %c0_i32_1 = arith.constant 0 : i32
    return %c0_i32, %c0_i32_0 : i32, i32
  }
  func.func @transform_4(%arg0: i32) -> (i32, i32) {
    %c0_i32 = arith.constant 0 : i32
    %c0_i32_0 = arith.constant 0 : i32
    %c0_i32_1 = arith.constant 0 : i32
    return %c0_i32, %c0_i32_0 : i32, i32
  }
  func.func @transform_5(%arg0: i32) -> (i32, i32) {
    %c0_i32 = arith.constant 0 : i32
    %c0_i32_0 = arith.constant 0 : i32
    %c0_i32_1 = arith.constant 0 : i32
    return %c0_i32, %c0_i32_0 : i32, i32
  }
  func.func @transform_6(%arg0: i32) -> (i32, i32) {
    %c0_i32 = arith.constant 0 : i32
    %c0_i32_0 = arith.constant 0 : i32
    return %arg0, %c0_i32 : i32, i32
  }
}

</mosaic_0001>

<bundles_post_ra>
// kernel: tpu_custom_call.1
= control target key start
LH: loop header
LB: loop body
LE: loop exit
PB: predicated region body
PF: predicated region fallthrough
CT: control target
= control target key end

     0   :  { %s2528_s21 = smov 0   ;;  %s3886_s0 = inlined_call_operand.vmem [shape: f32[256,7], index: 0, kind: input, shape index: {}]   ;;  %s3887_s1 = inlined_call_operand.vmem [shape: f32[256,3], index: 1, kind: input, shape index: {}]   ;;  %s3888_s2 = inlined_call_operand.vmem [shape: f32[3,32], index: 2, kind: input, shape index: {}]   ;;  %s3889_s3 = inlined_call_operand.vmem [shape: f32[1,32], index: 3, kind: input, shape index: {}]   ;;  %s3890_s4 = inlined_call_operand.vmem [shape: f32[32,8], index: 4, kind: input, shape index: {}]   ;;  %s3891_s5 = inlined_call_operand.vmem [shape: f32[1,8], index: 5, kind: input, shape index: {}]   ;;  %s3892_s6 = inlined_call_operand.vmem [shape: f32[256,8], index: 6, kind: output, shape index: {}]  }
   0x1 LB: > { %s2336_s22 = sadd.s32 4294967295, %s2484_s21   ;;  %p2340_p0 = scmp.ge.s32.totalorder %s2484_s21, 1  ;;  %s2484_s21 = sphi %s2528_s21, %s16_s21  }
   0x2   : > { %p224_p1 = scmp.lt.s32.totalorder %s2484_s21, 3 }
   0x4   : > { %p225_p2 = pnand %p2340_p0, %p224_p1 }
   0x6   : > { %228 = sbr.rel (%p225_p2) target bundleno = 797 (0x31d), region = 44 }
   0xb   : > { %s2341_s23 = sshll.u32 %s2336_s22, 4  ;;  %v2486_v0 = vmov 3   ;;  %v2487_v17 = vmov 4   ;;  %v3893_v18 = vmov 6   ;;  %v3901_v19 = vmov 2  }
   0xc   : > { %2404 = vset.pattern.permute.xlu2 %v2486_v0  ;;  %2403 = vset.pattern.permute.xlu1 %v2486_v0  ;;  %p260_p3 = scmp.lt.s32.totalorder %s2341_s23, 31  ;;  %v3899_v22 = vmov 1   ;;  %v3895_v24 = vmov 5   ;;  %v3897_v31 = vmov 0   ;;  %vm1151_vm0 = vcmask 1042432  }
   0xd   : > { %2402 = vset.pattern.permute.xlu0 %v2486_v0  ;;  %vm503_vm1 = vcmask 1040384   ;;  %vm663_vm2 = vcmask 1046528   ;;  %vm987_vm3 = vcmask 1045504   ;;  %vm827_vm4 = vcmask 1041408  }
   0xe   : > { %s4221_s23 = smov (!%p260_p3, %s2341_s23), 31  ;;  %vm1311_vm5 = vcmask 1044480   ;;  %vm1382_vm6 = vcmask 23552   ;;  %vm1519_vm7 = vcmask 261120   ;;  %vm2251_vm8 = vcmask 64512  }
   0xf   : > { %s2536_s24 = sshll.u32 %s4221_s23, 3 }
  0x10   : > { %s2542_s27 = scalar_lea.vmem %s3886_s0, %s2536_s24  ;;  %s2816_s8 = scalar_lea.vmem %s3887_s1, %s2536_s24 }
  0x11   : > { %v2545_v1 = vld [vmem:[%s2542_s27 + $0x20] sm:$0xff]  ;;  %v2548_v2 = vld [vmem:[%s2542_s27 + $0x10] sm:$0xff]  ;;  %v2557_v4 = vld [vmem:[%s2542_s27 + $0x28] sm:$0xff]  ;;  %s3620_s25 = scalar_lea.vmem %s3892_s6, %s2536_s24 }
  0x12   : > { %v2551_v3 = vld [vmem:[%s2542_s27] sm:$0xff]  ;;  %331 = vperm.xlu2 %2404, %v2545_v1   ;;  %321 = vperm.xlu1 %2403, %v2548_v2   ;;  %v2560_v5 = vld [vmem:[%s2542_s27 + $0x18] sm:$0xff]  ;;  %v2563_v6 = vld [vmem:[%s2542_s27 + $0x8] sm:$0xff] }
  0x13   : > { %311 = vperm.xlu0 %2402, %v2551_v3   ;;  %v2569_v7 = vld [vmem:[%s2542_s27 + $0x40] sm:$0xff]  ;;  %v2572_v8 = vld [vmem:[%s2542_s27 + $0x38] sm:$0xff]  ;;  %v2575_v9 = vld [vmem:[%s2542_s27 + $0x30] sm:$0xff] }
  0x14   : > { %v2581_v10 = vld [vmem:[%s2542_s27 + $0x58] sm:$0xff]  ;;  %v2584_v11 = vld [vmem:[%s2542_s27 + $0x50] sm:$0xff]  ;;  %v2587_v12 = vld [vmem:[%s2542_s27 + $0x48] sm:$0xff] }
  0x15   : > { %v2593_v13 = vld [vmem:[%s2542_s27 + $0x70] sm:$0xff]  ;;  %v2596_v14 = vld [vmem:[%s2542_s27 + $0x68] sm:$0xff]  ;;  %v2599_v15 = vld [vmem:[%s2542_s27 + $0x60] sm:$0xff] }
  0x16   : > { %v2605_v16 = vld [vmem:[%s2542_s27 + $0x78] sm:$0xff] }
  0x1a   : > { %336 = vperm.xlu2 %2404, %v2557_v4   ;;  %326 = vperm.xlu1 %2403, %v2560_v5  }
  0x1b   : > { %316 = vperm.xlu0 %2402, %v2563_v6  }
  0x22   : > { %351 = vperm.xlu2 %2404, %v2569_v7   ;;  %346 = vperm.xlu1 %2403, %v2572_v8  }
  0x23   : > { %341 = vperm.xlu0 %2402, %v2575_v9  }
  0x2a   : > { %366 = vperm.xlu2 %2404, %v2581_v10   ;;  %361 = vperm.xlu1 %2403, %v2584_v11  }
  0x2b   : > { %356 = vperm.xlu0 %2402, %v2587_v12  }
  0x32   : > { %381 = vperm.xlu2 %2404, %v2593_v13   ;;  %376 = vperm.xlu1 %2403, %v2596_v14  }
  0x33   : > { %371 = vperm.xlu0 %2402, %v2599_v15  }
  0x3a   : > { %2406 = vset.pattern.permute.xlu2 %v2487_v17  ;;  %2405 = vset.pattern.permute.xlu1 %v2487_v17 }
  0x3b   : > { %386 = vperm.xlu0 %2402, %v2605_v16   ;;  %410 = vperm.xlu2 %2406, %v2563_v6  }
  0x3c   : > { %406 = vperm.xlu1 %2405, %v2551_v3  }
  0x43   : > { %2407 = vset.pattern.permute.xlu0 %v2487_v17  ;;  %422 = vperm.xlu2 %2406, %v2545_v1   ;;  %v293_v17 = vld [vmem:[%s2816_s8] sm:$0xff] }
  0x44   : > { %418 = vperm.xlu1 %2405, %v2560_v5   ;;  %414 = vperm.xlu0 %2407, %v2548_v2  }
  0x4b   : > { %430 = vperm.xlu2 %2406, %v2575_v9  }
  0x4c   : > { %426 = vperm.xlu1 %2405, %v2557_v4   ;;  %434 = vperm.xlu0 %2407, %v2572_v8  }
  0x53   : > { %442 = vperm.xlu2 %2406, %v2587_v12  }
  0x54   : > { %438 = vperm.xlu1 %2405, %v2569_v7   ;;  %446 = vperm.xlu0 %2407, %v2584_v11  }
  0x5b   : > { %454 = vperm.xlu2 %2406, %v2599_v15  }
  0x5c   : > { %450 = vperm.xlu1 %2405, %v2581_v10   ;;  %458 = vperm.xlu0 %2407, %v2596_v14  }
  0x63   : > { %466 = vperm.xlu2 %2406, %v2605_v16  }
  0x64   : > { %462 = vperm.xlu1 %2405, %v2593_v13   ;;  %2414 = vset.pattern.permute.xlu0 %v3893_v18 }
  0x65   : > { %1114 = vperm.xlu0 %2414, %v2605_v16  }
  0x6b   : > { %2409 = vset.pattern.permute.xlu2 %v3901_v19 }
  0x6c   : > { %2408 = vset.pattern.permute.xlu1 %v3901_v19  ;;  %v2628_v20 = vpop.permute.xlu2 %331  ;;  %576 = vperm.xlu2 %2409, %v2548_v2  }
  0x6d   : > { %3997 = vst [vmem:[#allocation2_spill] sm:$0xff] %v2628_v20  ;;  %572 = vperm.xlu1 %2408, %v2563_v6   ;;  %1058 = vperm.xlu0 %2414, %v2563_v6  }
  0x74   : > { %v2633_v21 = vpop.permute.xlu2 %336  ;;  %584 = vperm.xlu2 %2409, %v2545_v1  }
  0x75   : > { %580 = vperm.xlu1 %2408, %v2560_v5   ;;  %2421 = vset.pattern.permute.xlu0 %v3899_v22 }
  0x76   : > { %904 = vperm.xlu0 %2421, %v2560_v5  }
  0x7c   : > { %v2639_v23 = vpop.permute.xlu2 %351  ;;  %2411 = vset.pattern.permute.xlu2 %v3899_v22 }
  0x7d   : > { %3998 = vst [vmem:[#allocation3_spill] sm:$0xff] %v2639_v23  ;;  %2410 = vset.pattern.permute.xlu1 %v3895_v24  ;;  %892 = vperm.xlu2 %2411, %v2551_v3  }
  0x7e   : > { %790 = vperm.xlu1 %2410, %v2605_v16   ;;  %2422 = vset.pattern.permute.xlu0 %v3901_v19 }
  0x7f   : > { %568 = vperm.xlu0 %2422, %v2551_v3  }
  0x84   : > { %v2647_v25 = vpop.permute.xlu2 %366  ;;  %v2649_v26 = vpop.permute.xlu1 %321 }
  0x85   : > { %3999 = vst [vmem:[#allocation4_spill] sm:$0xff] %v2647_v25  ;;  %2413 = vset.pattern.permute.xlu2 %v3893_v18  ;;  %v2652_v27 = vpop.permute.xlu0 %311 }
  0x86   : > { %4000 = vst [vmem:[#allocation5_spill] sm:$0xff] %v2652_v27  ;;  %2412 = vset.pattern.permute.xlu1 %v3899_v22  ;;  %1054 = vperm.xlu2 %2413, %v2551_v3  }
  0x87   : > { %896 = vperm.xlu1 %2412, %v2563_v6   ;;  %600 = vperm.xlu0 %2422, %v2569_v7  }
  0x8c   : > { %v2658_v28 = vpop.permute.xlu2 %381  ;;  %v2660_v29 = vpop.permute.xlu1 %326 }
  0x8d   : > { %4001 = vst [vmem:[#allocation6_spill] sm:$0xff] %v2658_v28  ;;  %v2662_v30 = vpop.permute.xlu0 %316 }
  0x8e   : > { %4002 = vst [vmem:[#allocation7_spill] sm:$0xff] %v2662_v30  ;;  %2416 = vset.pattern.permute.xlu2 %v3897_v31 }
  0x8f   : > { %2415 = vset.pattern.permute.xlu1 %v3897_v31  ;;  %604 = vperm.xlu0 %2422, %v2587_v12  }
  0x90   : > { %1220 = vperm.xlu2 %2416, %v2563_v6   ;;  %1216 = vperm.xlu1 %2415, %v2551_v3  }
  0x94   : > { %v2669_v32 = vpop.permute.xlu1 %346 }
  0x95   : > { %4003 = vst [vmem:[#allocation8_spill] sm:$0xff] %v2669_v32  ;;  %v2671_v33 = vpop.permute.xlu2 %410  ;;  %v2673_v34 = vpop.permute.xlu0 %341 }
  0x96   : > { %4004 = vst [vmem:[#allocation9_spill] sm:$0xff] %v2671_v33 }
  0x97   : > { %2443 = vset.pattern.permute.xlu0 %v3895_v24 }
  0x98   : > { %2418 = vset.pattern.permute.xlu2 %v3899_v22  ;;  %2417 = vset.pattern.permute.xlu1 %v3895_v24 }
  0x99   : > { %730 = vperm.xlu0 %2443, %v2551_v3   ;;  %900 = vperm.xlu2 %2418, %v2548_v2  }
  0x9a   : > { %734 = vperm.xlu1 %2417, %v2563_v6  }
  0x9c   : > { %v2681_v35 = vpop.permute.xlu1 %361 }
  0x9d   : > { %4005 = vst [vmem:[#allocation10_spill] sm:$0xff] %v2681_v35  ;;  %v2683_v36 = vpop.permute.xlu2 %422  ;;  %v2685_v37 = vpop.permute.xlu0 %356 }
  0x9e   : > { %4006 = vst [vmem:[#allocation11_spill] sm:$0xff] %v2685_v37  ;;  %v2919_v37 = vld [vmem:[%s2816_s8 + $0x18] sm:$0xff] }
  0xa1   : > { %750 = vperm.xlu0 %2443, %v2557_v4   ;;  %2420 = vset.pattern.permute.xlu2 %v3895_v24 }
  0xa2   : > { %2419 = vset.pattern.permute.xlu1 %v3897_v31  ;;  %738 = vperm.xlu2 %2420, %v2548_v2  }
  0xa3   : > { %1224 = vperm.xlu1 %2419, %v2548_v2  }
  0xa4   : > { %v2692_v38 = vpop.permute.xlu1 %376 }
  0xa5   : > { %4007 = vst [vmem:[#allocation12_spill] sm:$0xff] %v2692_v38  ;;  %v2694_v39 = vpop.permute.xlu2 %430  ;;  %v2696_v40 = vpop.permute.xlu0 %371 }
  0xa6   : > { %4008 = vst [vmem:[#allocation13_spill] sm:$0xff] %v2696_v40 }
  0xa9   : > { %754 = vperm.xlu0 %2443, %v2575_v9  }
  0xaa   : > { %2424 = vset.pattern.permute.xlu2 %v3897_v31 }
  0xab   : > { %2423 = vset.pattern.permute.xlu1 %v3893_v18  ;;  %1228 = vperm.xlu2 %2424, %v2560_v5  }
  0xac   : > { %1062 = vperm.xlu1 %2423, %v2548_v2  }
  0xad   : > { %v2703_v41 = vpop.permute.xlu2 %442  ;;  %v2705_v42 = vpop.permute.xlu0 %386 }
  0xae   : > { %4009 = vst [vmem:[#allocation14_spill] sm:$0xff] %v2703_v41  ;;  %v2707_v43 = vpop.permute.xlu1 %406 }
  0xaf   : > { %4010 = vst [vmem:[#allocation15_spill] sm:$0xff] %v2705_v42  ;;  %v2854_v42 = vld [vmem:[%s2816_s8 + $0x10] sm:$0xff] }
  0xb0   : > { %4011 = vst [vmem:[#allocation16_spill] sm:$0xff] %v2707_v43 }
  0xb1   : > { %762 = vperm.xlu0 %2443, %v2569_v7  }
  0xb3   : > { %2426 = vset.pattern.permute.xlu2 %v3899_v22 }
  0xb4   : > { %2425 = vset.pattern.permute.xlu1 %v3895_v24  ;;  %908 = vperm.xlu2 %2426, %v2545_v1  }
  0xb5   : > { %742 = vperm.xlu1 %2425, %v2560_v5   ;;  %v2714_v44 = vpop.permute.xlu2 %454 }
  0xb6   : > { %4012 = vst [vmem:[#allocation17_spill] sm:$0xff] %v2714_v44  ;;  %v2716_v45 = vpop.permute.xlu1 %418  ;;  %v2718_v46 = vpop.permute.xlu0 %414 }
  0xb7   : > { %4013 = vst [vmem:[#allocation18_spill] sm:$0xff] %v2718_v46 }
  0xb9   : > { %2446 = vset.pattern.permute.xlu0 %v3893_v18 }
  0xba   : > { %1066 = vperm.xlu0 %2446, %v2560_v5  }
  0xbc   : > { %2428 = vset.pattern.permute.xlu2 %v3897_v31 }
  0xbd   : > { %2427 = vset.pattern.permute.xlu1 %v3901_v19  ;;  %1232 = vperm.xlu2 %2428, %v2545_v1   ;;  %v2730_v49 = vpop.permute.xlu2 %466 }
  0xbe   : > { %588 = vperm.xlu1 %2427, %v2557_v4   ;;  %v2726_v47 = vpop.permute.xlu1 %426  ;;  %v2728_v48 = vpop.permute.xlu0 %434  ;;  %4015 = vst [vmem:[#allocation20_spill] sm:$0xff] %v2730_v49 }
  0xbf   : > { %4014 = vst [vmem:[#allocation19_spill] sm:$0xff] %v2728_v48 }
  0xc2   : > { %1070 = vperm.xlu0 %2446, %v2545_v1  }
  0xc5   : > { %2430 = vset.pattern.permute.xlu2 %v3899_v22 }
  0xc6   : > { %2429 = vset.pattern.permute.xlu1 %v3895_v24  ;;  %912 = vperm.xlu2 %2430, %v2557_v4   ;;  %v2736_v50 = vpop.permute.xlu1 %438  ;;  %v2738_v51 = vpop.permute.xlu0 %446 }
  0xc7   : > { %4016 = vst [vmem:[#allocation21_spill] sm:$0xff] %v2736_v50  ;;  %746 = vperm.xlu1 %2429, %v2545_v1   ;;  %v2741_v52 = vpop.permute.xlu2 %576 }
  0xc8   : > { %4017 = vst [vmem:[#allocation22_spill] sm:$0xff] %v2738_v51 }
  0xc9   : > { %4018 = vst [vmem:[#allocation23_spill] sm:$0xff] %v2741_v52 }
  0xca   : > { %1090 = vperm.xlu0 %2446, %v2587_v12  }
  0xce   : > { %2432 = vset.pattern.permute.xlu2 %v3897_v31  ;;  %v2745_v53 = vpop.permute.xlu1 %450  ;;  %v2748_v54 = vpop.permute.xlu0 %458 }
  0xcf   : > { %4019 = vst [vmem:[#allocation24_spill] sm:$0xff] %v2745_v53  ;;  %2431 = vset.pattern.permute.xlu1 %v3901_v19  ;;  %1236 = vperm.xlu2 %2432, %v2557_v4   ;;  %v2751_v55 = vpop.permute.xlu2 %584 }
  0xd0   : > { %4020 = vst [vmem:[#allocation25_spill] sm:$0xff] %v2748_v54  ;;  %592 = vperm.xlu1 %2431, %v2575_v9   ;;  %v4040_v54 = vmov 0  }
  0xd2   : > { %2454 = vset.pattern.permute.xlu0 %v3899_v22 }
  0xd3   : > { %936 = vperm.xlu0 %2454, %v2581_v10  }
  0xd6   : > { %v2756_v56 = vpop.permute.xlu1 %462 }
  0xd7   : > { %4021 = vst [vmem:[#allocation26_spill] sm:$0xff] %v2756_v56  ;;  %2434 = vset.pattern.permute.xlu2 %v3893_v18  ;;  %v2759_v57 = vpop.permute.xlu0 %1114  ;;  %v2764_v58 = vpop.permute.xlu2 %892  ;;  %v4039_v56 = vmov 2  }
  0xd8   : > { %4022 = vst [vmem:[#allocation27_spill] sm:$0xff] %v2759_v57  ;;  %2433 = vset.pattern.permute.xlu1 %v3899_v22  ;;  %1074 = vperm.xlu2 %2434, %v2557_v4   ;;  %v1377_v4 = vld [vmem:[%s3888_s2] sm:$0x7] }
  0xd9   : > { %916 = vperm.xlu1 %2433, %v2575_v9   ;;  %4023 = vst [vmem:[#allocation28_spill] sm:$0xff] %v2764_v58  ;;  %2347 = vmatpush.msk.msra.mxu0 %vm1151_vm0, %v1377_v4 }
  0xda   : > { %2382 = vmatpush.msk.msra.mxu3 %vm1151_vm0, %v1377_v4  ;;  %v2825_v4 = vld [vmem:[%s2816_s8 + $0x8] sm:$0xff] }
  0xdb   : > { %940 = vperm.xlu0 %2454, %v2599_v15  }
  0xdf   : > { %v2767_v59 = vpop.permute.xlu1 %572  ;;  %v2769_v60 = vpop.permute.xlu0 %1058 }
  0xe0   : > { %4024 = vst [vmem:[#allocation29_spill] sm:$0xff] %v2767_v59  ;;  %2436 = vset.pattern.permute.xlu2 %v3897_v31  ;;  %v2776_v61 = vpop.permute.xlu2 %1054 }
  0xe1   : > { %2435 = vset.pattern.permute.xlu1 %v3901_v19  ;;  %1240 = vperm.xlu2 %2436, %v2575_v9   ;;  %4025 = vst [vmem:[#allocation30_spill] sm:$0xff] %v2776_v61 }
  0xe2   : > { %596 = vperm.xlu1 %2435, %v2572_v8  }
  0xe3   : > { %2461 = vset.pattern.permute.xlu0 %v3897_v31 }
  0xe4   : > { %1264 = vperm.xlu0 %2461, %v2599_v15  }
  0xe7   : > { %v2779_v62 = vpop.permute.xlu1 %580 }
  0xe8   : > { %4026 = vst [vmem:[#allocation31_spill] sm:$0xff] %v2779_v62  ;;  %v2781_v63 = vpop.permute.xlu0 %904 }
  0xe9   : > { %4027 = vst [vmem:[#allocation32_spill] sm:$0xff] %v2781_v63  ;;  %2438 = vset.pattern.permute.xlu2 %v3893_v18 }
  0xea   : > { %2437 = vset.pattern.permute.xlu1 %v3899_v22  ;;  %1078 = vperm.xlu2 %2438, %v2575_v9   ;;  %v2788_v0 = vpop.permute.xlu2 %1220  ;;  %v308_v9 = vld [vmem:[%s2816_s8 + $0x78] sm:$0xff] }
  0xeb   : > { %920 = vperm.xlu1 %2437, %v2572_v8   ;;  %4028 = vst [vmem:[#allocation33_spill] sm:$0xff] %v2788_v0 }
  0xec   : > { %1268 = vperm.xlu0 %2461, %v2596_v14  }
  0xf0   : > { %v2790_v1 = vpop.permute.xlu1 %790 }
  0xf1   : > { %4029 = vst [vmem:[#allocation34_spill] sm:$0xff] %v2790_v1  ;;  %v2792_v2 = vpop.permute.xlu0 %568 }
  0xf2   : > { %4030 = vst [vmem:[#allocation35_spill] sm:$0xff] %v2792_v2  ;;  %2440 = vset.pattern.permute.xlu2 %v3895_v24  ;;  %v2830_v24 = vmul.f32 %v2730_v49, %v308_v9  ;;  %v2843_v28 = vmul.f32 %v2792_v2, %v293_v17  ;;  %v2862_v49 = vmul.f32 %v2741_v52, %v2854_v42 }
  0xf3   : > { %2439 = vset.pattern.permute.xlu1 %v3897_v31  ;;  %758 = vperm.xlu2 %2440, %v2572_v8   ;;  %v2800_v3 = vpop.permute.xlu2 %900  ;;  %v2834_v31 = vmul.f32 %v2671_v33, %v2825_v4  ;;  %v389_v33 = vmul.f32 %v2652_v27, %v293_v17  ;;  %v2874_v27 = vmul.f32 %v2718_v46, %v2854_v42 }
  0xf4   : > { %1244 = vperm.xlu1 %2439, %v2572_v8   ;;  %2468 = vset.pattern.permute.xlu0 %v3893_v18  ;;  %4031 = vst [vmem:[#allocation36_spill] sm:$0xff] %v2800_v3  ;;  %v4041_v2 = vrot.slane %v2830_v24, 7 }
  0xf5   : > { %1106 = vperm.xlu0 %2468, %v2596_v14   ;;  %4035 = vst [vmem:[#allocation40_spill] sm:$0xff] %v2830_v24  ;;  %v4042_v44 = vrot.slane %v2834_v31, 7  ;;  %v2877_v24 = vmul.f32 %v2790_v1, %v308_v9  ;;  %v4045_v1 = vrot.slane %v2843_v28, 1 }
  0xf6   : > { %4038 = vst [vmem:[#allocation43_spill] sm:$0xff] %v2843_v28  ;;  %v4048_v28 = vmov 5  }
  0xf7   : > { %4043 = vst [vmem:[#allocation44_spill] sm:$0xff] %v2877_v24 }
  0xf9   : > { %v2807_v5 = vpop.permute.xlu1 %896  ;;  %v2809_v6 = vpop.permute.xlu0 %600 }
  0xfa   : > { %4032 = vst [vmem:[#allocation37_spill] sm:$0xff] %v2807_v5  ;;  %v2881_v40 = vmul.f32 %v2807_v5, %v2825_v4 }
  0xfb   : > { %4033 = vst [vmem:[#allocation38_spill] sm:$0xff] %v2809_v6  ;;  %2442 = vset.pattern.permute.xlu2 %v3893_v18 }
  0xfc   : > { %2441 = vset.pattern.permute.xlu1 %v3899_v22  ;;  %1082 = vperm.xlu2 %2442, %v2572_v8   ;;  %v2827_v18 = vpop.permute.xlu2 %738  ;;  %v469_v8 = vmul.f32 %v2707_v43, %v293_v17  ;;  %v632_v43 = vmul.f32 %v2767_v59, %v2825_v4  ;;  %v390_v59 = vmul.f32 %v2662_v30, %v2825_v4 }
  0xfd   : > { %924 = vperm.xlu1 %2441, %v2569_v7   ;;  %1110 = vperm.xlu0 %2468, %v2593_v13   ;;  %4034 = vst [vmem:[#allocation39_spill] sm:$0xff] %v2827_v18  ;;  %v2884_v30 = vmul.f32 %v2759_v57, %v308_v9  ;;  %v2903_v9 = vmul.f32 %v2788_v0, %v2825_v4  ;;  %v4047_v57 = vmov 1  }
  0xfe   : > { %v504_v38 = vrot.slane %v469_v8, 7 }
  0xff   : > { %v1313_v41 = vrot.slane %v2903_v9, 3  ;;  %v4053_v9 = vrot.slane %v2884_v30, 5 }
 0x100   : > { %v550_v8 = vsel %vm503_vm1, %v4041_v2, %v504_v38  ;;  %v506_v25 = vsel %vm503_vm1, %v504_v38, %v4042_v44  ;;  %v665_v2 = vrot.slane %v632_v43, 1  ;;  %v2887_v38 = vmul.f32 %v2764_v58, %v293_v17 }
 0x101   : > { %v2837_v22 = vpop.permute.xlu0 %604  ;;  %v551_v52 = vadd.f32 %v550_v8, %v389_v33  ;;  %v2893_v43 = vmul.f32 %v2776_v61, %v293_v17  ;;  %v957_v61 = vmul.f32 %v2800_v3, %v2854_v42  ;;  %v552_v35 = vadd.f32 %v506_v25, %v390_v59 }
 0x102   : > { %4036 = vst [vmem:[#allocation41_spill] sm:$0xff] %v2837_v22  ;;  %v2839_v19 = vpop.permute.xlu1 %1216  ;;  %v666_v5 = vsel %vm663_vm2, %v4045_v1, %v665_v2  ;;  %v989_v1 = vrot.slane %v2881_v40, 2  ;;  %v4049_v40 = vrot.slane %v2862_v49, 1 }
 0x103   : > { %4037 = vst [vmem:[#allocation42_spill] sm:$0xff] %v2839_v19  ;;  %v713_v51 = vadd.f32 %v666_v5, %v551_v52  ;;  %v2933_v52 = vmul.f32 %v2779_v62, %v2919_v37 }
 0x104   : > { %2445 = vset.pattern.permute.xlu2 %v4039_v56 }
 0x105   : > { %2444 = vset.pattern.permute.xlu1 %v4040_v54  ;;  %608 = vperm.xlu2 %2445, %v2584_v11   ;;  %v2870_v53 = vpop.permute.xlu2 %1228 }
 0x106   : > { %1248 = vperm.xlu1 %2444, %v2569_v7   ;;  %2474 = vset.pattern.permute.xlu0 %v4040_v54 }
 0x10b   : > { %v2889_v44 = vpop.permute.xlu0 %730 }
 0x10c   : > { %4044 = vst [vmem:[#allocation45_spill] sm:$0xff] %v2889_v44  ;;  %v793_v33 = vmul.f32 %v2889_v44, %v293_v17  ;;  %v2899_v8 = vpop.permute.xlu1 %734  ;;  %v2911_v44 = vmul.f32 %v2839_v19, %v293_v17  ;;  %v668_v17 = vsel %vm663_vm2, %v665_v2, %v4049_v40  ;;  %v4050_v19 = vrot.slane %v2877_v24, 6 }
 0x10d   : > { %4046 = vst [vmem:[#allocation46_spill] sm:$0xff] %v2899_v8  ;;  %v794_v46 = vmul.f32 %v2899_v8, %v2825_v4  ;;  %2448 = vset.pattern.permute.xlu2 %v4047_v57  ;;  %v4051_v2 = vrot.slane %v2887_v38, 2  ;;  %v714_v24 = vadd.f32 %v668_v17, %v552_v35  ;;  %v669_v35 = vrot.slane %v2933_v52, 1 }
 0x10e   : > { %v828_v58 = vrot.slane %v793_v33, 6  ;;  %2447 = vset.pattern.permute.xlu1 %v4048_v28  ;;  %928 = vperm.xlu2 %2448, %v2587_v12   ;;  %v1152_v33 = vrot.slane %v2893_v43, 5  ;;  %v2947_v59 = vpop.permute.xlu2 %908 }
 0x10f   : > { %v829_v8 = vrot.slane %v794_v46, 6  ;;  %766 = vperm.xlu1 %2447, %v2587_v12   ;;  %v990_v43 = vsel %vm987_vm3, %v4051_v2, %v989_v1  ;;  %4052 = vst [vmem:[#allocation47_spill] sm:$0xff] %v2947_v59  ;;  %v991_v46 = vrot.slane %v957_v61, 2  ;;  %v4057_v61 = vrot.slane %v2834_v31, 7 }
 0x110   : > { %v874_v0 = vsel %vm827_vm4, %v4050_v19, %v828_v58  ;;  %v2943_v19 = vmul.f32 %v2827_v18, %v2854_v42  ;;  %v1198_v2 = vsel %vm1151_vm0, %v4053_v9, %v1152_v33  ;;  %v4054_v18 = vmov 6  }
 0x111   : > { %v875_v5 = vadd.f32 %v874_v0, %v713_v51  ;;  %v830_v3 = vsel %vm827_vm4, %v828_v58, %v829_v8  ;;  %v1118_v0 = vmul.f32 %v2769_v60, %v2825_v4  ;;  %v391_v9 = vmul.f32 %v2649_v26, %v2854_v42 }
 0x112   : > { %v876_v58 = vadd.f32 %v830_v3, %v714_v24  ;;  %v2970_v24 = vmul.f32 %v2781_v63, %v2919_v37 }
 0x113   : > { %v2945_v25 = vpop.permute.xlu0 %750  ;;  %v1037_v51 = vadd.f32 %v990_v43, %v875_v5  ;;  %v4055_v5 = vrot.slane %v2911_v44, 3  ;;  %v4056_v43 = vrot.slane %v2874_v27, 7 }
 0x115   : > { %v2955_v17 = vpop.permute.xlu1 %1224  ;;  %v1199_v40 = vadd.f32 %v1198_v2, %v1037_v51  ;;  %v1314_v4 = vsel %vm1311_vm5, %v4055_v5, %v1313_v41  ;;  %v508_v52 = vsel %vm503_vm1, %v4057_v61, %v4056_v43  ;;  %v1153_v2 = vrot.slane %v1118_v0, 5 }
 0x116   : > { %v1281_v62 = vmul.f32 %v2955_v17, %v2854_v42  ;;  %2450 = vset.pattern.permute.xlu2 %v4054_v18  ;;  %v992_v5 = vsel %vm987_vm3, %v989_v1, %v991_v46  ;;  %v4058_v43 = vrot.slane %v2862_v49, 1  ;;  %v553_v63 = vadd.f32 %v508_v52, %v391_v9 }
 0x117   : > { %2449 = vset.pattern.permute.xlu1 %v4047_v57  ;;  %1086 = vperm.xlu2 %2450, %v2569_v7   ;;  %v1361_v51 = vadd.f32 %v1314_v4, %v1199_v40  ;;  %v1038_v3 = vadd.f32 %v992_v5, %v876_v58  ;;  %v993_v7 = vrot.slane %v2970_v24, 2  ;;  %v4059_v40 = vrot.slane %v2943_v19, 6  ;;  %v2995_v58 = vpop.permute.xlu2 %1232 }
 0x118   : > { %v1315_v31 = vrot.slane %v1281_v62, 3  ;;  %932 = vperm.xlu1 %2449, %v2584_v11   ;;  %v670_v61 = vsel %vm663_vm2, %v4058_v43, %v669_v35  ;;  %v1154_v1 = vsel %vm1151_vm0, %v1152_v33, %v1153_v2  ;;  %v2993_v43 = vmul.f32 %v2870_v53, %v2919_v37  ;;  %4060 = vst [vmem:[#allocation48_spill] sm:$0xff] %v2995_v58 }
 0x119   : > { %2348 = vmatmul.msk.f32.vlgmr.msra.gmra.mxu0 %vm1382_vm6, %v1361_v51  ;;  %v832_v4 = vsel %vm827_vm4, %v829_v8, %v4059_v40  ;;  %v715_v62 = vadd.f32 %v670_v61, %v553_v63  ;;  %v1200_v52 = vadd.f32 %v1154_v1, %v1038_v3  ;;  %v2999_v24 = vmul.f32 %v2716_v45, %v2919_v37  ;;  %v297_v3 = vld [vmem:[%s2816_s8 + $0x20] sm:$0xff] }
 0x11a   : > { %v1316_v49 = vsel %vm1311_vm5, %v1313_v41, %v1315_v31  ;;  %v994_v63 = vsel %vm987_vm3, %v991_v46, %v993_v7  ;;  %v1317_v9 = vrot.slane %v2993_v43, 3  ;;  %v635_v61 = vmul.f32 %v2751_v55, %v297_v3 }
 0x11b   : > { %v2987_v0 = vpop.permute.xlu0 %754  ;;  %v877_v8 = vadd.f32 %v832_v4, %v715_v62  ;;  %v1362_v41 = vadd.f32 %v1316_v49, %v1200_v52  ;;  %v509_v46 = vrot.slane %v2999_v24, 7  ;;  %v3019_v62 = vmul.f32 %v2947_v59, %v297_v3 }
 0x11c   : > { %v1318_v49 = vsel %vm1311_vm5, %v1315_v31, %v1317_v9  ;;  %v4062_v43 = vrot.slane %v2874_v27, 7  ;;  %v671_v52 = vrot.slane %v635_v61, 1  ;;  %v392_v24 = vmul.f32 %v2660_v29, %v2919_v37 }
 0x11e   : > { %v3001_v51 = vpop.permute.xlu1 %1062 }
 0x11f   : > { %v1119_v33 = vmul.f32 %v3001_v51, %v2854_v42  ;;  %2452 = vset.pattern.permute.xlu2 %v4039_v56  ;;  %v1039_v42 = vadd.f32 %v994_v63, %v877_v8  ;;  %v672_v63 = vsel %vm663_vm2, %v669_v35, %v671_v52 }
 0x120   : > { %2451 = vset.pattern.permute.xlu1 %v4040_v54  ;;  %612 = vperm.xlu2 %2452, %v2581_v10   ;;  %v3027_v8 = vpop.permute.xlu2 %912 }
 0x121   : > { %v1155_v5 = vrot.slane %v1119_v33, 5  ;;  %1252 = vperm.xlu1 %2451, %v2587_v12   ;;  %2349 = vmatmul.msk.f32.gmra.mxu0 %vm1382_vm6, %v1362_v41  ;;  %v510_v12 = vsel %vm503_vm1, %v4062_v43, %v509_v46  ;;  %4063 = vst [vmem:[#allocation50_spill] sm:$0xff] %v3027_v8  ;;  %v995_v41 = vrot.slane %v3019_v62, 2  ;;  %v4064_v62 = vrot.slane %v2943_v19, 6 }
 0x122   : > { %v554_v27 = vadd.f32 %v510_v12, %v392_v24  ;;  %v473_v19 = vmul.f32 %v2683_v36, %v297_v3 }
 0x123   : > { %v1156_v40 = vsel %vm1151_vm0, %v1153_v2, %v1155_v5  ;;  %v3016_v4 = vpop.permute.xlu0 %762  ;;  %v996_v35 = vsel %vm987_vm3, %v993_v7, %v995_v41 }
 0x124   : > { %4061 = vst [vmem:[#allocation49_spill] sm:$0xff] %v3016_v4  ;;  %v1201_v1 = vadd.f32 %v1156_v40, %v1039_v42  ;;  %v716_v42 = vadd.f32 %v672_v63, %v554_v27  ;;  %v1283_v40 = vmul.f32 %v2995_v58, %v297_v3  ;;  %v298_v63 = vld [vmem:[%s2816_s8 + $0x28] sm:$0xff] }
 0x126   : > { %v1363_v33 = vadd.f32 %v1318_v49, %v1201_v1  ;;  %v1319_v24 = vrot.slane %v1283_v40, 3 }
 0x127   : > { %v3029_v2 = vpop.permute.xlu1 %742 }
 0x128   : > { %v796_v31 = vmul.f32 %v3029_v2, %v2919_v37  ;;  %2453 = vset.pattern.permute.xlu2 %v4048_v28 }
 0x129   : > { %1256 = vperm.xlu1 %2451, %v2584_v11   ;;  %2350 = vmatmul.msk.f32.gmra.mxu0 %vm1382_vm6, %v1363_v33  ;;  %v3052_v58 = vpop.permute.xlu2 %1236 }
 0x12a   : > { %v833_v61 = vrot.slane %v796_v31, 6  ;;  %770 = vperm.xlu2 %2453, %v2584_v11  }
 0x12c   : > { %v834_v1 = vsel %vm827_vm4, %v4064_v62, %v833_v61  ;;  %v3044_v49 = vpop.permute.xlu0 %1066 }
 0x12d   : > { %v878_v43 = vadd.f32 %v834_v1, %v716_v42  ;;  %v1120_v12 = vmul.f32 %v3044_v49, %v2919_v37  ;;  %v1320_v42 = vsel %vm1311_vm5, %v1317_v9, %v1319_v24 }
 0x12f   : > { %v1157_v33 = vrot.slane %v1120_v12, 5  ;;  %v1040_v31 = vadd.f32 %v996_v35, %v878_v43  ;;  %v511_v35 = vrot.slane %v473_v19, 7  ;;  %v960_v43 = vmul.f32 %v3027_v8, %v298_v63 }
 0x130   : > { %v3048_v59 = vpop.permute.xlu1 %588 }
 0x131   : > { %4065 = vst [vmem:[#allocation51_spill] sm:$0xff] %v3048_v59  ;;  %v1158_v27 = vsel %vm1151_vm0, %v1155_v5, %v1157_v33  ;;  %2455 = vset.pattern.permute.xlu1 %v4054_v18  ;;  %v636_v7 = vmul.f32 %v3048_v59, %v298_v63  ;;  %v512_v1 = vsel %vm503_vm1, %v509_v46, %v511_v35  ;;  %v997_v46 = vrot.slane %v960_v43, 2  ;;  %v3086_v43 = vld [vmem:[%s2816_s8 + $0x30] sm:$0xff] }
 0x132   : > { %2456 = vset.pattern.permute.xlu2 %v4039_v56  ;;  %1094 = vperm.xlu1 %2455, %v2584_v11   ;;  %v1202_v37 = vadd.f32 %v1158_v27, %v1040_v31  ;;  %v393_v11 = vmul.f32 %v2628_v20, %v297_v3 }
 0x133   : > { %616 = vperm.xlu2 %2456, %v2599_v15   ;;  %v673_v5 = vrot.slane %v636_v7, 1  ;;  %v3073_v7 = vpop.permute.xlu2 %1074 }
 0x134   : > { %v1364_v40 = vadd.f32 %v1320_v42, %v1202_v37  ;;  %v3062_v62 = vpop.permute.xlu0 %1070  ;;  %v555_v19 = vadd.f32 %v512_v1, %v393_v11  ;;  %v1284_v37 = vmul.f32 %v3052_v58, %v298_v63 }
 0x135   : > { %4066 = vst [vmem:[#allocation52_spill] sm:$0xff] %v3062_v62  ;;  %v1121_v12 = vmul.f32 %v3062_v62, %v297_v3  ;;  %v674_v27 = vsel %vm663_vm2, %v671_v52, %v673_v5  ;;  %v998_v62 = vsel %vm987_vm3, %v995_v41, %v997_v46 }
 0x136   : > { %2351 = vmatmul.msk.f32.gmra.mxu0 %vm1382_vm6, %v1364_v40  ;;  %v717_v52 = vadd.f32 %v674_v27, %v555_v19  ;;  %v1321_v8 = vrot.slane %v1284_v37, 3 }
 0x137   : > { %v1159_v42 = vrot.slane %v1121_v12, 5 }
 0x138   : > { %v1322_v41 = vsel %vm1311_vm5, %v1319_v24, %v1321_v8 }
 0x139   : > { %v3068_v31 = vpop.permute.xlu1 %746  ;;  %v1160_v20 = vsel %vm1151_vm0, %v1157_v33, %v1159_v42 }
 0x13a   : > { %v797_v9 = vmul.f32 %v3068_v31, %v297_v3  ;;  %2457 = vset.pattern.permute.xlu1 %v4040_v54  ;;  %v3080_v3 = vmul.f32 %v2726_v47, %v298_v63 }
 0x13b   : > { %2458 = vset.pattern.permute.xlu2 %v4048_v28  ;;  %1260 = vperm.xlu1 %2457, %v2581_v10  }
 0x13c   : > { %v835_v40 = vrot.slane %v797_v9, 6  ;;  %774 = vperm.xlu2 %2458, %v2581_v10   ;;  %v513_v12 = vrot.slane %v3080_v3, 7  ;;  %v394_v3 = vmul.f32 %v2633_v21, %v298_v63 }
 0x13e   : > { %v836_v1 = vsel %vm827_vm4, %v833_v61, %v835_v40  ;;  %v3097_v61 = vpop.permute.xlu2 %1240  ;;  %v514_v37 = vsel %vm503_vm1, %v511_v35, %v513_v12 }
 0x13f   : > { %v879_v11 = vadd.f32 %v836_v1, %v717_v52  ;;  %4067 = vst [vmem:[#allocation53_spill] sm:$0xff] %v3097_v61  ;;  %v798_v52 = vmul.f32 %v2945_v25, %v298_v63  ;;  %v3113_v35 = vmul.f32 %v3097_v61, %v3086_v43 }
 0x141   : > { %v1041_v59 = vadd.f32 %v998_v62, %v879_v11  ;;  %v837_v24 = vrot.slane %v798_v52, 6  ;;  %v1323_v52 = vrot.slane %v3113_v35, 3 }
 0x142   : > { %v3089_v9 = vpop.permute.xlu1 %592 }
 0x143   : > { %v637_v27 = vmul.f32 %v3089_v9, %v3086_v43  ;;  %2459 = vset.pattern.permute.xlu1 %v4054_v18  ;;  %v1203_v19 = vadd.f32 %v1160_v20, %v1041_v59  ;;  %v3105_v20 = vmul.f32 %v3073_v7, %v298_v63  ;;  %v556_v59 = vadd.f32 %v514_v37, %v394_v3 }
 0x144   : > { %2460 = vset.pattern.permute.xlu2 %v4039_v56  ;;  %1098 = vperm.xlu1 %2459, %v2581_v10   ;;  %v838_v63 = vsel %vm827_vm4, %v835_v40, %v837_v24  ;;  %v1324_v40 = vsel %vm1311_vm5, %v1321_v8, %v1323_v52  ;;  %v799_v8 = vmul.f32 %v2987_v0, %v3086_v43 }
 0x145   : > { %v675_v33 = vrot.slane %v637_v27, 1  ;;  %620 = vperm.xlu2 %2460, %v2596_v14   ;;  %v1365_v62 = vadd.f32 %v1322_v41, %v1203_v19  ;;  %v1161_v27 = vrot.slane %v3105_v20, 5 }
 0x146   : > { %v3122_v41 = vpop.permute.xlu2 %1078 }
 0x147   : > { %2352 = vmatmul.msk.f32.gmra.mxu0 %vm1382_vm6, %v1365_v62  ;;  %v676_v10 = vsel %vm663_vm2, %v673_v5, %v675_v33  ;;  %v1162_v37 = vsel %vm1151_vm0, %v1159_v42, %v1161_v27 }
 0x148   : > { %v718_v1 = vadd.f32 %v676_v10, %v556_v59  ;;  %v3128_v59 = vld [vmem:[%s2816_s8 + $0x38] sm:$0xff] }
 0x14a   : > { %v880_v62 = vadd.f32 %v838_v63, %v718_v1 }
 0x14b   : > { %v3108_v11 = vpop.permute.xlu1 %916 }
 0x14c   : > { %v961_v19 = vmul.f32 %v3108_v11, %v3086_v43  ;;  %2462 = vset.pattern.permute.xlu1 %v4048_v28 }
 0x14d   : > { %2463 = vset.pattern.permute.xlu2 %v4047_v57  ;;  %778 = vperm.xlu1 %2462, %v2599_v15  }
 0x14e   : > { %v999_v5 = vrot.slane %v961_v19, 2  ;;  %944 = vperm.xlu2 %2463, %v2596_v14   ;;  %v475_v19 = vmul.f32 %v2694_v39, %v3086_v43  ;;  %v3144_v35 = vpop.permute.xlu2 %758 }
 0x150   : > { %v1000_v3 = vsel %vm987_vm3, %v997_v46, %v999_v5  ;;  %v515_v46 = vrot.slane %v475_v19, 7 }
 0x151   : > { %v1042_v20 = vadd.f32 %v1000_v3, %v880_v62  ;;  %v395_v62 = vmul.f32 %v2673_v34, %v3086_v43 }
 0x153   : > { %v1204_v10 = vadd.f32 %v1162_v37, %v1042_v20  ;;  %v839_v37 = vrot.slane %v799_v8, 6 }
 0x154   : > { %v3130_v61 = vpop.permute.xlu1 %596 }
 0x155   : > { %v638_v1 = vmul.f32 %v3130_v61, %v3128_v59  ;;  %2464 = vset.pattern.permute.xlu1 %v4054_v18  ;;  %v1366_v42 = vadd.f32 %v1324_v40, %v1204_v10  ;;  %v516_v18 = vsel %vm503_vm1, %v513_v12, %v515_v46  ;;  %v840_v12 = vsel %vm827_vm4, %v837_v24, %v839_v37  ;;  %v3174_v24 = vld [vmem:[%s2816_s8 + $0x40] sm:$0xff] }
 0x156   : > { %2465 = vset.pattern.permute.xlu2 %v4039_v56  ;;  %1102 = vperm.xlu1 %2464, %v2599_v15   ;;  %v557_v20 = vadd.f32 %v516_v18, %v395_v62  ;;  %v3166_v62 = vmul.f32 %v2728_v48, %v3128_v59 }
 0x157   : > { %624 = vperm.xlu2 %2465, %v2593_v13   ;;  %2353 = vmatmul.msk.f32.gmra.mxu0 %vm1382_vm6, %v1366_v42  ;;  %v677_v63 = vrot.slane %v638_v1, 1  ;;  %v3161_v1 = vpop.permute.xlu2 %1082 }
 0x158   : > { %4068 = vst [vmem:[#allocation54_spill] sm:$0xff] %v3161_v1 }
 0x159   : > { %v678_v3 = vsel %vm663_vm2, %v675_v33, %v677_v63  ;;  %v1123_v33 = vmul.f32 %v3122_v41, %v3086_v43  ;;  %v517_v43 = vrot.slane %v3166_v62, 7 }
 0x15a   : > { %v719_v40 = vadd.f32 %v678_v3, %v557_v20 }
 0x15b   : > { %v1163_v18 = vrot.slane %v1123_v33, 5 }
 0x15c   : > { %v881_v8 = vadd.f32 %v840_v12, %v719_v40 }
 0x15d   : > { %v3150_v15 = vpop.permute.xlu1 %920 }
 0x15e   : > { %v962_v10 = vmul.f32 %v3150_v15, %v3128_v59  ;;  %2466 = vset.pattern.permute.xlu1 %v4048_v28 }
 0x15f   : > { %2467 = vset.pattern.permute.xlu2 %v4047_v57  ;;  %782 = vperm.xlu1 %2466, %v2596_v14   ;;  %v3185_v33 = vpop.permute.xlu2 %608 }
 0x160   : > { %v1001_v19 = vrot.slane %v962_v10, 2  ;;  %948 = vperm.xlu2 %2467, %v2593_v13   ;;  %v1164_v10 = vsel %vm1151_vm0, %v1161_v27, %v1163_v18  ;;  %4069 = vst [vmem:[#allocation55_spill] sm:$0xff] %v3185_v33  ;;  %v396_v27 = vmul.f32 %v2669_v32, %v3128_v59 }
 0x162   : > { %v1002_v42 = vsel %vm987_vm3, %v999_v5, %v1001_v19  ;;  %v3181_v5 = vmul.f32 %v2809_v6, %v3174_v24  ;;  %v3194_v6 = vmul.f32 %v3144_v35, %v3128_v59 }
 0x163   : > { %v1043_v14 = vadd.f32 %v1002_v42, %v881_v8  ;;  %v518_v8 = vsel %vm503_vm1, %v515_v46, %v517_v43 }
 0x164   : > { %v679_v48 = vrot.slane %v3181_v5, 1  ;;  %v841_v46 = vrot.slane %v3194_v6, 6 }
 0x165   : > { %v1205_v12 = vadd.f32 %v1164_v10, %v1043_v14 }
 0x166   : > { %v3168_v3 = vpop.permute.xlu1 %1244  ;;  %v680_v14 = vsel %vm663_vm2, %v677_v63, %v679_v48  ;;  %v842_v63 = vsel %vm827_vm4, %v839_v37, %v841_v46 }
 0x167   : > { %v1286_v20 = vmul.f32 %v3168_v3, %v3128_v59  ;;  %2469 = vset.pattern.permute.xlu1 %v4039_v56 }
 0x168   : > { %2470 = vset.pattern.permute.xlu2 %v4040_v54  ;;  %628 = vperm.xlu1 %2469, %v2605_v16  }
 0x169   : > { %v1325_v40 = vrot.slane %v1286_v20, 3  ;;  %1272 = vperm.xlu2 %2470, %v2593_v13  }
 0x16b   : > { %v1326_v56 = vsel %vm1311_vm5, %v1323_v52, %v1325_v40  ;;  %v558_v52 = vadd.f32 %v518_v8, %v396_v27 }
 0x16c   : > { %v1367_v42 = vadd.f32 %v1326_v56, %v1205_v12  ;;  %v3215_v56 = vmul.f32 %v3161_v1, %v3128_v59  ;;  %v1516_v59 = vld [vmem:[%s3890_s4 + $0x8] sm:$0xff] }
 0x16d   : > { %v720_v5 = vadd.f32 %v680_v14, %v558_v52  ;;  %v1515_v14 = vld [vmem:[%s3890_s4] sm:$0xff] }
 0x16e   : > { %2354 = vmatmul.msk.f32.gmra.mxu0 %vm1382_vm6, %v1367_v42  ;;  %v3217_v42 = vpop.permute.xlu2 %928  ;;  %v1165_v37 = vrot.slane %v3215_v56, 5 }
 0x16f   : > { %v3200_v20 = vpop.permute.xlu1 %924  ;;  %4071 = vst [vmem:[#allocation57_spill] sm:$0xff] %v3217_v42  ;;  %v882_v6 = vadd.f32 %v842_v63, %v720_v5 }
 0x170   : > { %4070 = vst [vmem:[#allocation56_spill] sm:$0xff] %v3200_v20  ;;  %v3204_v10 = vmul.f32 %v3200_v20, %v3174_v24  ;;  %2471 = vset.pattern.permute.xlu1 %v4048_v28  ;;  %v1518_v28 = vld [vmem:[%s3890_s4 + $0x18] sm:$0xff]  ;;  %v1166_v52 = vsel %vm1151_vm0, %v1163_v18, %v1165_v37 }
 0x171   : > { %2472 = vset.pattern.permute.xlu2 %v4047_v57  ;;  %786 = vperm.xlu1 %2471, %v2593_v13   ;;  %v1517_v57 = vld [vmem:[%s3890_s4 + $0x10] sm:$0xff] }
 0x172   : > { %v1003_v12 = vrot.slane %v3204_v10, 2  ;;  %952 = vperm.xlu2 %2472, %v2605_v16   ;;  %1580 = vmatpush.msra.mxu1 %v1518_v28 }
 0x173   : > { %2383 = vmatpush.msra.mxu2 %v1518_v28 }
 0x174   : > { %v1004_v13 = vsel %vm987_vm3, %v1001_v19, %v1003_v12  ;;  %1581 = vmatpush.msra.mxu1 %v1517_v57 }
 0x175   : > { %2384 = vmatpush.msra.mxu2 %v1517_v57  ;;  %v1044_v8 = vadd.f32 %v1004_v13, %v882_v6  ;;  %v302_v13 = vld [vmem:[%s2816_s8 + $0x48] sm:$0xff]  ;;  %v801_v6 = vmul.f32 %v3016_v4, %v3174_v24 }
 0x176   : > { %1582 = vmatpush.msra.mxu1 %v1516_v59  ;;  %v3243_v63 = vpop.permute.xlu2 %1086  ;;  %v640_v18 = vmul.f32 %v2837_v22, %v302_v13 }
 0x177   : > { %2385 = vmatpush.msra.mxu2 %v1516_v59  ;;  %v1206_v5 = vadd.f32 %v1166_v52, %v1044_v8  ;;  %4073 = vst [vmem:[#allocation59_spill] sm:$0xff] %v3243_v63 }
 0x178   : > { %v3230_v27 = vpop.permute.xlu1 %1248  ;;  %1583 = vmatpush.msra.mxu1 %v1515_v14  ;;  %v681_v8 = vrot.slane %v640_v18, 1 }
 0x179   : > { %4072 = vst [vmem:[#allocation58_spill] sm:$0xff] %v3230_v27  ;;  %v3234_v19 = vmul.f32 %v3230_v27, %v3174_v24  ;;  %2473 = vset.pattern.permute.xlu1 %v4040_v54  ;;  %2386 = vmatpush.msra.mxu2 %v1515_v14  ;;  %v843_v14 = vrot.slane %v801_v6, 6 }
 0x17a   : > { %1276 = vperm.xlu1 %2473, %v2605_v16   ;;  %v477_v16 = vmul.f32 %v2736_v50, %v3174_v24  ;;  %v682_v22 = vsel %vm663_vm2, %v679_v48, %v681_v8 }
 0x17b   : > { %v1327_v10 = vrot.slane %v3234_v19, 3 }
 0x17c   : > { %v519_v57 = vrot.slane %v477_v16, 7 }
 0x17d   : > { %v1328_v56 = vsel %vm1311_vm5, %v1325_v40, %v1327_v10  ;;  %v964_v40 = vmul.f32 %v3217_v42, %v302_v13  ;;  %v844_v42 = vsel %vm827_vm4, %v841_v46, %v843_v14 }
 0x17e   : > { %v1368_v54 = vadd.f32 %v1328_v56, %v1206_v5  ;;  %v3255_v59 = vpop.permute.xlu2 %612  ;;  %v520_v19 = vsel %vm503_vm1, %v517_v43, %v519_v57  ;;  %v397_v5 = vmul.f32 %v2639_v23, %v3174_v24  ;;  %v3266_v56 = vld [vmem:[%s2816_s8 + $0x50] sm:$0xff]  ;;  %v1125_v43 = vmul.f32 %v3243_v63, %v3174_v24 }
 0x17f   : > { %4075 = vst [vmem:[#allocation61_spill] sm:$0xff] %v3255_v59  ;;  %v3274_v18 = vmul.f32 %v3185_v33, %v3266_v56  ;;  %v1005_v62 = vrot.slane %v964_v40, 2  ;;  %v4078_v33 = vld [vmem:[#allocation11_spill] sm:$0xff] }
 0x180   : > { %2355 = vmatmul.msk.f32.gmra.mxu0 %vm1382_vm6, %v1368_v54  ;;  %v4077_v54 = vld [vmem:[#allocation14_spill] sm:$0xff]  ;;  %v559_v6 = vadd.f32 %v520_v19, %v397_v5  ;;  %v1167_v27 = vrot.slane %v1125_v43, 5  ;;  %v398_v24 = vmul.f32 %v4078_v33, %v302_v13 }
 0x181   : > { %v3247_v28 = vpop.permute.xlu1 %766  ;;  %v3269_v16 = vmul.f32 %v4077_v54, %v302_v13  ;;  %v683_v50 = vrot.slane %v3274_v18, 1  ;;  %v1006_v48 = vsel %vm987_vm3, %v1003_v12, %v1005_v62 }
 0x182   : > { %4074 = vst [vmem:[#allocation60_spill] sm:$0xff] %v3247_v28  ;;  %v3280_v23 = vmul.f32 %v3247_v28, %v302_v13  ;;  %v721_v54 = vadd.f32 %v682_v22, %v559_v6  ;;  %v3293_v28 = vpop.permute.xlu0 %1090  ;;  %v3304_v6 = vld [vmem:[%s3889_s3] ss:$0 sm:$0xff] }
 0x183   : > { %v521_v4 = vrot.slane %v3269_v16, 7  ;;  %4080 = vst [vmem:[#allocation64_spill] sm:$0xff] %v3293_v28  ;;  %v3297_v16 = vmul.f32 %v3293_v28, %v302_v13 }
 0x184   : > { %v883_v19 = vadd.f32 %v844_v42, %v721_v54  ;;  %v684_v42 = vsel %vm663_vm2, %v681_v8, %v683_v50 }
 0x185   : > { %v522_v46 = vsel %vm503_vm1, %v519_v57, %v521_v4  ;;  %v1168_v57 = vsel %vm1151_vm0, %v1165_v37, %v1167_v27  ;;  %v1169_v32 = vrot.slane %v3297_v16, 5 }
 0x186   : > { %v3290_v5 = vpop.permute.xlu2 %770  ;;  %v1045_v12 = vadd.f32 %v1006_v48, %v883_v19  ;;  %v560_v28 = vadd.f32 %v522_v46, %v398_v24  ;;  %v4081_v48 = vrot.slane %v3280_v23, 6 }
 0x187   : > { %4079 = vst [vmem:[#allocation63_spill] sm:$0xff] %v3290_v5 }
 0x188   : > { %v846_v19 = vsel %vm827_vm4, %v843_v14, %v4081_v48  ;;  %v722_v63 = vadd.f32 %v684_v42, %v560_v28  ;;  %v1207_v20 = vadd.f32 %v1168_v57, %v1045_v12 }
 0x18a   : > { %v3261_v52 = vpop.permute.xlu1 %932  ;;  %v884_v8 = vadd.f32 %v846_v19, %v722_v63  ;;  %v3336_v57 = vpop.permute.xlu0 %936 }
 0x18b   : > { %4076 = vst [vmem:[#allocation62_spill] sm:$0xff] %v3261_v52  ;;  %v3287_v40 = vmul.f32 %v3261_v52, %v3266_v56 }
 0x18d   : > { %v3964_v54 = vrot.slane %v3287_v40, 2 }
 0x18f   : > { %v1008_v37 = vsel %vm987_vm3, %v1005_v62, %v3964_v54 }
 0x190   : > { %v1046_v14 = vadd.f32 %v1008_v37, %v884_v8  ;;  %v803_v8 = vmul.f32 %v3290_v5, %v3266_v56 }
 0x193   : > { %v3299_v43 = vpop.permute.xlu1 %1252 }
 0x194   : > { %v1288_v22 = vmul.f32 %v3299_v43, %v302_v13 }
 0x196   : > { %v1329_v52 = vrot.slane %v1288_v22, 3  ;;  %v1451_v33 = vpop.f32.mrf.mxu0  ;;  %v3321_v22 = vpop.permute.xlu2 %616 }
 0x197   : > { %v1452_v1 = vadd.f32 %v3304_v6, %v1451_v33  ;;  %4082 = vst [vmem:[#allocation65_spill] sm:$0xff] %v3321_v22  ;;  %v1170_v33 = vsel %vm1151_vm0, %v1167_v27, %v1169_v32 }
 0x198   : > { %v1330_v13 = vsel %vm1311_vm5, %v1327_v10, %v1329_v52  ;;  %v4083_v10 = vld [vmem:[#allocation22_spill] sm:$0xff]  ;;  %v1208_v42 = vadd.f32 %v1170_v33, %v1046_v14 }
 0x199   : > { %v1499_v24 = vmax.f32 %v1452_v1, 0.0  ;;  %v1369_v46 = vadd.f32 %v1330_v13, %v1207_v20  ;;  %v479_v16 = vmul.f32 %v4083_v10, %v3266_v56  ;;  %v3333_v20 = vld [vmem:[%s2816_s8 + $0x58] sm:$0xff]  ;;  %4084 = vst [vmem:[#allocation22_spill] sm:$0xff] %v3336_v57 }
 0x19a   : > { %v642_v48 = vmul.f32 %v3255_v59, %v3333_v20 }
 0x19b   : > { %v3323_v28 = vpop.permute.xlu1 %1256  ;;  %2356 = vmatmul.msk.f32.gmra.mxu0 %vm1382_vm6, %v1369_v46  ;;  %2364 = vmatmul.msk.f32.vlgmr.msra.gmra.mxu1 %vm1519_vm7, %v1499_v24  ;;  %v523_v13 = vrot.slane %v479_v16, 7  ;;  %v966_v24 = vmul.f32 %v3336_v57, %v3333_v20 }
 0x19c   : > { %v1289_v62 = vmul.f32 %v3323_v28, %v3266_v56  ;;  %v685_v46 = vrot.slane %v642_v48, 1 }
 0x19d   : > { %v1009_v54 = vrot.slane %v966_v24, 2 }
 0x19e   : > { %v1331_v63 = vrot.slane %v1289_v62, 3  ;;  %v1454_v1 = vpop.f32.mrf.mxu0  ;;  %v3349_v33 = vpop.permute.xlu2 %774  ;;  %v847_v62 = vrot.slane %v803_v8, 6 }
 0x19f   : > { %v1455_v12 = vadd.f32 %v3304_v6, %v1454_v1  ;;  %4086 = vst [vmem:[#allocation67_spill] sm:$0xff] %v3349_v33  ;;  %v3379_v18 = vmul.f32 %v3349_v33, %v3333_v20 }
 0x1a0   : > { %v1332_v27 = vsel %vm1311_vm5, %v1329_v52, %v1331_v63  ;;  %v524_v52 = vsel %vm503_vm1, %v521_v4, %v523_v13  ;;  %v686_v4 = vsel %vm663_vm2, %v683_v50, %v685_v46  ;;  %v4091_v50 = vrot.slane %v3287_v40, 2 }
 0x1a1   : > { %v1500_v19 = vmax.f32 %v1455_v12, 0.0  ;;  %v1370_v37 = vadd.f32 %v1332_v27, %v1208_v42  ;;  %v4087_v12 = vld [vmem:[#allocation10_spill] sm:$0xff]  ;;  %v4088_v27 = vld [vmem:[#allocation24_spill] sm:$0xff]  ;;  %v849_v40 = vrot.slane %v3379_v18, 6 }
 0x1a2   : > { %v399_v42 = vmul.f32 %v4087_v12, %v3266_v56 }
 0x1a3   : > { %2357 = vmatmul.msk.f32.vlgmr.msra.gmra.mxu3 %vm1382_vm6, %v1370_v37  ;;  %2365 = vmatmul.msk.f32.gmra.mxu1 %vm1519_vm7, %v1500_v19  ;;  %v3358_v19 = vmul.f32 %v4088_v27, %v3333_v20  ;;  %v3362_v37 = vld [vmem:[%s2816_s8 + $0x60] sm:$0xff]  ;;  %v4090_v27 = vrot.slane %v3280_v23, 6 }
 0x1a4   : > { %v3347_v14 = vpop.permute.xlu1 %1094  ;;  %v561_v8 = vadd.f32 %v524_v52, %v399_v42  ;;  %v1010_v52 = vsel %vm987_vm3, %v4091_v50, %v1009_v54 }
 0x1a5   : > { %4085 = vst [vmem:[#allocation66_spill] sm:$0xff] %v3347_v14  ;;  %v1127_v16 = vmul.f32 %v3347_v14, %v3266_v56  ;;  %v3369_v14 = vmul.f32 %v3321_v22, %v3362_v37  ;;  %v3371_v56 = vpop.permute.xlu0 %940  ;;  %v848_v12 = vsel %vm827_vm4, %v4090_v27, %v847_v62  ;;  %v525_v59 = vrot.slane %v3358_v19, 7 }
 0x1a6   : > { %v1457_v1 = vpop.f32.mrf.mxu0  ;;  %4089 = vst [vmem:[#allocation68_spill] sm:$0xff] %v3371_v56  ;;  %v723_v24 = vadd.f32 %v686_v4, %v561_v8  ;;  %v3394_v4 = vmul.f32 %v3371_v56, %v3362_v37  ;;  %v3397_v8 = vpop.permute.xlu2 %620  ;;  %v850_v56 = vsel %vm827_vm4, %v847_v62, %v849_v40 }
 0x1a7   : > { %v1458_v48 = vadd.f32 %v3304_v6, %v1457_v1  ;;  %v1171_v1 = vrot.slane %v1127_v16, 5  ;;  %v526_v19 = vsel %vm503_vm1, %v523_v13, %v525_v59  ;;  %4093 = vst [vmem:[#allocation70_spill] sm:$0xff] %v3397_v8 }
 0x1a8   : > { %v885_v42 = vadd.f32 %v848_v12, %v723_v24  ;;  %v1011_v13 = vrot.slane %v3394_v4, 2  ;;  %v306_v4 = vld [vmem:[%s2816_s8 + $0x68] sm:$0xff] }
 0x1a9   : > { %v1501_v57 = vmax.f32 %v1458_v48, 0.0  ;;  %v687_v48 = vrot.slane %v3369_v14, 1  ;;  %v1172_v16 = vsel %vm1151_vm0, %v1169_v32, %v1171_v1  ;;  %v4094_v14 = vld [vmem:[#allocation4_spill] sm:$0xff] }
 0x1aa   : > { %v400_v12 = vmul.f32 %v4094_v14, %v3333_v20 }
 0x1ab   : > { %2366 = vmatmul.msk.f32.gmra.mxu1 %vm1519_vm7, %v1501_v57  ;;  %v1047_v57 = vadd.f32 %v1010_v52, %v885_v42  ;;  %v688_v32 = vsel %vm663_vm2, %v685_v46, %v687_v48 }
 0x1ac   : > { %v562_v22 = vadd.f32 %v526_v19, %v400_v12  ;;  %v1012_v19 = vsel %vm987_vm3, %v1009_v54, %v1011_v13  ;;  %v4098_v12 = vld [vmem:[#allocation17_spill] sm:$0xff] }
 0x1ad   : > { %v3386_v23 = vpop.permute.xlu1 %1260  ;;  %v1209_v50 = vadd.f32 %v1172_v16, %v1047_v57  ;;  %v3405_v18 = vpop.permute.xlu0 %1264 }
 0x1ae   : > { %4092 = vst [vmem:[#allocation69_spill] sm:$0xff] %v3386_v23  ;;  %v1290_v27 = vmul.f32 %v3386_v23, %v3333_v20  ;;  %v724_v42 = vadd.f32 %v688_v32, %v562_v22  ;;  %v3414_v62 = vpop.permute.xlu2 %944  ;;  %v481_v32 = vmul.f32 %v4098_v12, %v3362_v37 }
 0x1af   : > { %4095 = vst [vmem:[#allocation4_spill] sm:$0xff] %v3405_v18 }
 0x1b0   : > { %v1333_v24 = vrot.slane %v1290_v27, 3  ;;  %v1291_v27 = vmul.f32 %v3405_v18, %v3362_v37  ;;  %v886_v46 = vadd.f32 %v850_v56, %v724_v42  ;;  %4097 = vst [vmem:[#allocation72_spill] sm:$0xff] %v3414_v62  ;;  %v527_v42 = vrot.slane %v481_v32, 7 }
 0x1b2   : > { %v1334_v33 = vsel %vm1311_vm5, %v1331_v63, %v1333_v24  ;;  %v1335_v22 = vrot.slane %v1291_v27, 3  ;;  %v1048_v57 = vadd.f32 %v1012_v19, %v886_v46  ;;  %v4100_v27 = vld [vmem:[#allocation13_spill] sm:$0xff]  ;;  %v528_v19 = vsel %vm503_vm1, %v525_v59, %v527_v42 }
 0x1b3   : > { %v1460_v23 = vpop.f32.mrf.mxu0  ;;  %v1371_v52 = vadd.f32 %v1334_v33, %v1209_v50 }
 0x1b4   : > { %v1461_v5 = vadd.f32 %v3304_v6, %v1460_v23  ;;  %v1336_v54 = vsel %vm1311_vm5, %v1333_v24, %v1335_v22 }
 0x1b5   : > { %2358 = vmatmul.msk.f32.gmra.mxu3 %vm1382_vm6, %v1371_v52 }
 0x1b6   : > { %v1502_v16 = vmax.f32 %v1461_v5, 0.0  ;;  %v3411_v63 = vpop.permute.xlu1 %1098  ;;  %v644_v5 = vmul.f32 %v3397_v8, %v306_v4 }
 0x1b7   : > { %4096 = vst [vmem:[#allocation71_spill] sm:$0xff] %v3411_v63  ;;  %v1128_v33 = vmul.f32 %v3411_v63, %v3333_v20 }
 0x1b8   : > { %2367 = vmatmul.msk.f32.gmra.mxu1 %vm1519_vm7, %v1502_v16  ;;  %v689_v18 = vrot.slane %v644_v5, 1  ;;  %v401_v16 = vmul.f32 %v4100_v27, %v3362_v37  ;;  %v3437_v5 = vpop.permute.xlu0 %1268 }
 0x1b9   : > { %v1173_v23 = vrot.slane %v1128_v33, 5  ;;  %v3434_v33 = vpop.permute.xlu2 %624  ;;  %4102 = vst [vmem:[#allocation75_spill] sm:$0xff] %v3437_v5 }
 0x1ba   : > { %4101 = vst [vmem:[#allocation74_spill] sm:$0xff] %v3434_v33  ;;  %v563_v32 = vadd.f32 %v528_v19, %v401_v16 }
 0x1bb   : > { %v1174_v56 = vsel %vm1151_vm0, %v1171_v1, %v1173_v23  ;;  %v968_v1 = vmul.f32 %v3414_v62, %v306_v4  ;;  %v4103_v62 = vld [vmem:[#allocation25_spill] sm:$0xff] }
 0x1bc   : > { %v1210_v50 = vadd.f32 %v1174_v56, %v1048_v57  ;;  %v690_v57 = vsel %vm663_vm2, %v687_v48, %v689_v18 }
 0x1bd   : > { %v725_v59 = vadd.f32 %v690_v57, %v563_v32 }
 0x1be   : > { %v1372_v52 = vadd.f32 %v1336_v54, %v1210_v50  ;;  %v1292_v50 = vmul.f32 %v3437_v5, %v306_v4  ;;  %v1013_v54 = vrot.slane %v968_v1, 2  ;;  %v4106_v5 = vld [vmem:[#allocation12_spill] sm:$0xff] }
 0x1bf   : > { %v3425_v20 = vpop.permute.xlu1 %778 }
 0x1c0   : > { %4099 = vst [vmem:[#allocation73_spill] sm:$0xff] %v3425_v20  ;;  %v805_v46 = vmul.f32 %v3425_v20, %v3362_v37  ;;  %2359 = vmatmul.msk.f32.gmra.mxu3 %vm1382_vm6, %v1372_v52  ;;  %v482_v20 = vmul.f32 %v4103_v62, %v306_v4  ;;  %v1337_v48 = vrot.slane %v1292_v50, 3  ;;  %v1014_v16 = vsel %vm987_vm3, %v1011_v13, %v1013_v54 }
 0x1c1   : > { %v3449_v19 = vpop.permute.xlu2 %948 }
 0x1c2   : > { %v851_v24 = vrot.slane %v805_v46, 6  ;;  %v3446_v46 = vld [vmem:[%s2816_s8 + $0x70] sm:$0xff]  ;;  %4105 = vst [vmem:[#allocation77_spill] sm:$0xff] %v3449_v19  ;;  %v529_v32 = vrot.slane %v482_v20, 7 }
 0x1c3   : > { %v969_v62 = vmul.f32 %v3449_v19, %v3446_v46 }
 0x1c4   : > { %v1463_v56 = vpop.f32.mrf.mxu0  ;;  %v852_v27 = vsel %vm827_vm4, %v849_v40, %v851_v24  ;;  %v645_v40 = vmul.f32 %v3434_v33, %v3446_v46  ;;  %v530_v13 = vsel %vm503_vm1, %v527_v42, %v529_v32 }
 0x1c5   : > { %v1464_v52 = vadd.f32 %v3304_v6, %v1463_v56  ;;  %v887_v12 = vadd.f32 %v852_v27, %v725_v59 }
 0x1c6   : > { %v691_v50 = vrot.slane %v645_v40, 1 }
 0x1c7   : > { %v1503_v8 = vmax.f32 %v1464_v52, 0.0  ;;  %v1049_v27 = vadd.f32 %v1014_v16, %v887_v12  ;;  %v1338_v52 = vsel %vm1311_vm5, %v1335_v22, %v1337_v48  ;;  %v1015_v16 = vrot.slane %v969_v62, 2 }
 0x1c8   : > { %v3443_v63 = vpop.permute.xlu1 %1102 }
 0x1c9   : > { %4104 = vst [vmem:[#allocation76_spill] sm:$0xff] %v3443_v63  ;;  %v1129_v1 = vmul.f32 %v3443_v63, %v3362_v37  ;;  %2368 = vmatmul.msk.f32.gmra.mxu1 %vm1519_vm7, %v1503_v8  ;;  %v402_v8 = vmul.f32 %v4106_v5, %v306_v4  ;;  %v3462_v63 = vpop.permute.xlu0 %1106  ;;  %v3470_v42 = vpop.permute.xlu2 %1272 }
 0x1ca   : > { %4107 = vst [vmem:[#allocation78_spill] sm:$0xff] %v3462_v63  ;;  %v1130_v12 = vmul.f32 %v3462_v63, %v306_v4 }
 0x1cb   : > { %v1175_v57 = vrot.slane %v1129_v1, 5  ;;  %v564_v20 = vadd.f32 %v530_v13, %v402_v8  ;;  %4108 = vst [vmem:[#allocation79_spill] sm:$0xff] %v3470_v42  ;;  %v1293_v1 = vmul.f32 %v3470_v42, %v3446_v46  ;;  %v4109_v8 = vld [vmem:[#allocation26_spill] sm:$0xff] }
 0x1cc   : > { %v483_v42 = vmul.f32 %v4109_v8, %v3446_v46 }
 0x1cd   : > { %v1176_v56 = vsel %vm1151_vm0, %v1173_v23, %v1175_v57  ;;  %v692_v23 = vsel %vm663_vm2, %v689_v18, %v691_v50  ;;  %v1339_v13 = vrot.slane %v1293_v1, 3 }
 0x1ce   : > { %v1211_v59 = vadd.f32 %v1176_v56, %v1049_v27  ;;  %v726_v56 = vadd.f32 %v692_v23, %v564_v20  ;;  %v2477_v20 = vld [vmem:[%s2816_s8 + $0x78] sm:$0xff] }
 0x1d0   : > { %v1373_v37 = vadd.f32 %v1338_v52, %v1211_v59  ;;  %v1177_v59 = vrot.slane %v1130_v12, 5 }
 0x1d1   : > { %v3464_v33 = vpop.permute.xlu1 %782  ;;  %v3488_v1 = vpop.permute.xlu2 %952 }
 0x1d2   : > { %v806_v22 = vmul.f32 %v3464_v33, %v306_v4  ;;  %2360 = vmatmul.msk.f32.gmra.mxu3 %vm1382_vm6, %v1373_v37  ;;  %v1016_v37 = vsel %vm987_vm3, %v1013_v54, %v1015_v16  ;;  %4111 = vst [vmem:[#allocation81_spill] sm:$0xff] %v3488_v1 }
 0x1d4   : > { %v853_v40 = vrot.slane %v806_v22, 6  ;;  %v1466_v27 = vpop.f32.mrf.mxu0  ;;  %v1178_v22 = vsel %vm1151_vm0, %v1175_v57, %v1177_v59 }
 0x1d5   : > { %v1467_v52 = vadd.f32 %v3304_v6, %v1466_v27 }
 0x1d6   : > { %v854_v18 = vsel %vm827_vm4, %v851_v24, %v853_v40  ;;  %v1340_v24 = vsel %vm1311_vm5, %v1337_v48, %v1339_v13 }
 0x1d7   : > { %v888_v19 = vadd.f32 %v854_v18, %v726_v56  ;;  %v1504_v4 = vmax.f32 %v1467_v52, 0.0  ;;  %v531_v56 = vrot.slane %v483_v42, 7  ;;  %v4112_v52 = vld [vmem:[#allocation6_spill] sm:$0xff]  ;;  %v970_v42 = vmul.f32 %v2477_v20, %v3488_v1 }
 0x1d8   : > { %v403_v57 = vmul.f32 %v4112_v52, %v3446_v46 }
 0x1d9   : > { %2369 = vmatmul.msk.f32.gmra.mxu1 %vm1519_vm7, %v1504_v4  ;;  %v1050_v62 = vadd.f32 %v1016_v37, %v888_v19  ;;  %v532_v19 = vsel %vm503_vm1, %v529_v32, %v531_v56  ;;  %v4114_v32 = vld [vmem:[#allocation15_spill] sm:$0xff]  ;;  %v1017_v8 = vrot.slane %v970_v42, 2 }
 0x1da   : > { %v3481_v5 = vpop.permute.xlu1 %628  ;;  %v565_v48 = vadd.f32 %v532_v19, %v403_v57  ;;  %v4117_v57 = vld [vmem:[#allocation43_spill] sm:$0xff] }
 0x1db   : > { %4110 = vst [vmem:[#allocation80_spill] sm:$0xff] %v3481_v5  ;;  %v1212_v23 = vadd.f32 %v1178_v22, %v1050_v62  ;;  %v646_v12 = vmul.f32 %v2477_v20, %v3481_v5  ;;  %v3498_v62 = vpop.permute.xlu0 %1110  ;;  %v1018_v19 = vsel %vm987_vm3, %v1015_v16, %v1017_v8  ;;  %v4118_v1 = vrot.slane %v4117_v57, 1 }
 0x1dd   : > { %v1374_v27 = vadd.f32 %v1340_v24, %v1212_v23  ;;  %v693_v54 = vrot.slane %v646_v12, 1  ;;  %v404_v12 = vmul.f32 %v2477_v20, %v4114_v32 }
 0x1df   : > { %2361 = vmatmul.msk.f32.gmra.mxu3 %vm1382_vm6, %v1374_v27  ;;  %v694_v4 = vsel %vm663_vm2, %v691_v50, %v693_v54  ;;  %v4115_v27 = vld [vmem:[#allocation40_spill] sm:$0xff]  ;;  %v1131_v50 = vmul.f32 %v3498_v62, %v3446_v46 }
 0x1e0   : > { %v727_v23 = vadd.f32 %v694_v4, %v565_v48  ;;  %v4116_v5 = vrot.slane %v4115_v27, 7 }
 0x1e1   : > { %v1179_v63 = vrot.slane %v1131_v50, 5 }
 0x1e2   : > { %v533_v52 = vsel %vm503_vm1, %v531_v56, %v4116_v5  ;;  %v4119_v5 = vld [vmem:[#allocation44_spill] sm:$0xff] }
 0x1e3   : > { %v3492_v18 = vpop.permute.xlu1 %786  ;;  %v566_v48 = vadd.f32 %v533_v52, %v404_v12  ;;  %v4120_v56 = vrot.slane %v4119_v5, 6 }
 0x1e4   : > { %4113 = vst [vmem:[#allocation82_spill] sm:$0xff] %v3492_v18  ;;  %v807_v37 = vmul.f32 %v3492_v18, %v3446_v46 }
 0x1e6   : > { %v855_v22 = vrot.slane %v807_v37, 6  ;;  %v712_v37 = vsel %vm663_vm2, %v693_v54, %v4118_v1 }
 0x1e8   : > { %v856_v24 = vsel %vm827_vm4, %v853_v40, %v855_v22  ;;  %v857_v46 = vsel %vm827_vm4, %v855_v22, %v4120_v56  ;;  %v4125_v56 = vld [vmem:[#allocation28_spill] sm:$0xff] }
 0x1e9   : > { %v889_v18 = vadd.f32 %v856_v24, %v727_v23  ;;  %v728_v23 = vadd.f32 %v712_v37, %v566_v48  ;;  %v1180_v24 = vsel %vm1151_vm0, %v1177_v59, %v1179_v63  ;;  %v4123_v59 = vrot.slane %v2911_v44, 3  ;;  %v4124_v44 = vld [vmem:[#allocation35_spill] sm:$0xff] }
 0x1eb   : > { %v1469_v4 = vpop.f32.mrf.mxu0  ;;  %v1051_v27 = vadd.f32 %v1018_v19, %v889_v18  ;;  %v890_v54 = vadd.f32 %v857_v46, %v728_v23  ;;  %v4121_v18 = vrot.slane %v2887_v38, 2 }
 0x1ec   : > { %v1470_v32 = vadd.f32 %v3304_v6, %v1469_v4  ;;  %v3512_v40 = vpop.permute.xlu1 %1276 }
 0x1ed   : > { %v1294_v42 = vmul.f32 %v2477_v20, %v3512_v40  ;;  %v1213_v1 = vadd.f32 %v1180_v24, %v1051_v27  ;;  %v1036_v50 = vsel %vm987_vm3, %v1017_v8, %v4121_v18  ;;  %v4122_v20 = vrot.slane %v2884_v30, 5  ;;  %v4129_v24 = vld [vmem:[#allocation9_spill] sm:$0xff] }
 0x1ee   : > { %v1505_v16 = vmax.f32 %v1470_v32, 0.0  ;;  %v1052_v22 = vadd.f32 %v1036_v50, %v890_v54  ;;  %v4130_v54 = vld [vmem:[#allocation29_spill] sm:$0xff] }
 0x1ef   : > { %v1341_v57 = vrot.slane %v1294_v42, 3  ;;  %v1181_v32 = vsel %vm1151_vm0, %v1179_v63, %v4122_v20  ;;  %v4127_v42 = vld [vmem:[#allocation42_spill] sm:$0xff]  ;;  %v4132_v18 = vld [vmem:[#allocation33_spill] sm:$0xff] }
 0x1f0   : > { %2370 = vmatmul.msk.f32.gmra.mxu1 %vm1519_vm7, %v1505_v16  ;;  %v1214_v37 = vadd.f32 %v1181_v32, %v1052_v22  ;;  %v4133_v22 = vld [vmem:[#allocation16_spill] sm:$0xff] }
 0x1f1   : > { %v1342_v52 = vsel %vm1311_vm5, %v1339_v13, %v1341_v57  ;;  %v1360_v19 = vsel %vm1311_vm5, %v1341_v57, %v4123_v59 }
 0x1f2   : > { %v1375_v12 = vadd.f32 %v1342_v52, %v1213_v1  ;;  %v1376_v4 = vadd.f32 %v1360_v19, %v1214_v37  ;;  %v4131_v52 = vld [vmem:[#allocation37_spill] sm:$0xff] }
 0x1f4   : > { %2362 = vmatmul.msk.f32.gmra.mxu3 %vm1382_vm6, %v1375_v12 }
 0x1fc   : > { %2363 = vmatmul.msk.f32.gmra.mxu3 %vm1382_vm6, %v1376_v4 }
 0x1fd   : > { %v1472_v13 = vpop.f32.mrf.mxu0 }
 0x1fe   : > { %v1473_v38 = vadd.f32 %v3304_v6, %v1472_v13 }
 0x200   : > { %v1506_v48 = vmax.f32 %v1473_v38, 0.0 }
 0x202   : > { %2371 = vmatmul.msk.f32.gmra.mxu1 %vm1519_vm7, %v1506_v48 }
 0x218   : > { %v1475_v8 = vpop.f32.mrf.mxu0  ;;  %v3534_v27 = vpop.f32.mrf.mxu1 }
 0x219   : > { %v1476_v30 = vadd.f32 %v3304_v6, %v1475_v8  ;;  %v3540_v5 = vmul.f32 %v3534_v27, %v4124_v44  ;;  %v3544_v46 = vmul.f32 %v3534_v27, %v4125_v56  ;;  %v3548_v23 = vmul.f32 %v3534_v27, %v4127_v42  ;;  %v4136_v56 = vld [vmem:[#allocation46_spill] sm:$0xff] }
 0x21a   : > { %v3556_v20 = vmul.f32 %v3534_v27, %v4133_v22  ;;  %v4140_v22 = vld [vmem:[#allocation7_spill] sm:$0xff] }
 0x21b   : > { %v1507_v63 = vmax.f32 %v1476_v30, 0.0  ;;  %4126 = vst [vmem:[#allocation40_spill] sm:$0xff] %v3544_v46  ;;  %v3989_v32 = vrot.slane %v3540_v5, 1  ;;  %v3988_v19 = vrot.slane %v3544_v46, 2  ;;  %v3987_v37 = vrot.slane %v3548_v23, 3  ;;  %v4144_v46 = vld [vmem:[#allocation18_spill] sm:$0xff] }
 0x21c   : > { %4128 = vst [vmem:[#allocation43_spill] sm:$0xff] %v3548_v23  ;;  %v3991_v44 = vrot.slane %v3556_v20, 7  ;;  %v4142_v23 = vld [vmem:[#allocation30_spill] sm:$0xff] }
 0x21d   : > { %2372 = vmatmul.msk.f32.vlgmr.msra.gmra.mxu2 %vm1519_vm7, %v1507_v63 }
 0x220   : > { %v1588_v16 = vpop.f32.mrf.mxu1 }
 0x221   : > { %v1650_v57 = vmul.f32 %v1588_v16, %v4129_v24  ;;  %v1747_v1 = vmul.f32 %v1588_v16, %v4130_v54  ;;  %v1941_v12 = vmul.f32 %v1588_v16, %v4131_v52  ;;  %v2135_v50 = vmul.f32 %v1588_v16, %v4132_v18  ;;  %v4137_v54 = vld [vmem:[#allocation45_spill] sm:$0xff]  ;;  %v4139_v18 = vld [vmem:[#allocation23_spill] sm:$0xff] }
 0x222   : > { %v1844_v42 = vmul.f32 %v1588_v16, %v4136_v56  ;;  %v2038_v56 = vmul.f32 %v1588_v16, %v2769_v60 }
 0x223   : > { %v1779_v59 = vrot.slane %v1747_v1, 1  ;;  %v1973_v4 = vrot.slane %v1941_v12, 2  ;;  %v2167_v13 = vrot.slane %v2135_v50, 3  ;;  %v1684_v38 = vrot.slane %v1650_v57, 7 }
 0x224   : > { %v3581_v1 = vmul.f32 %v3534_v27, %v4137_v54  ;;  %v3593_v54 = vmul.f32 %v3534_v27, %v4142_v23 }
 0x225   : > { %v3564_v48 = vsel %vm663_vm2, %v3989_v32, %v1779_v59  ;;  %v3569_v8 = vsel %vm987_vm3, %v3988_v19, %v1973_v4  ;;  %v3574_v30 = vsel %vm1311_vm5, %v3987_v37, %v2167_v13  ;;  %v1685_v52 = vsel %vm503_vm1, %v3991_v44, %v1684_v38  ;;  %v4141_v19 = vld [vmem:[#allocation36_spill] sm:$0xff] }
 0x226   : > { %4134 = vst [vmem:[#allocation44_spill] sm:$0xff] %v3569_v8  ;;  %v1478_v63 = vpop.f32.mrf.mxu3  ;;  %v1634_v37 = vmul.f32 %v1588_v16, %v4140_v22  ;;  %v3994_v44 = vrot.slane %v3581_v1, 6  ;;  %v2072_v16 = vrot.slane %v2038_v56, 5  ;;  %v3993_v23 = vrot.slane %v3593_v54, 5  ;;  %v3611_v56 = vld [vmem:[%s3891_s5] ss:$0 sm:$0xff] }
 0x227   : > { %4135 = vst [vmem:[#allocation35_spill] sm:$0xff] %v3574_v30  ;;  %v1479_v24 = vadd.f32 %v3304_v6, %v1478_v63  ;;  %v1878_v30 = vrot.slane %v1844_v42, 6 }
 0x228   : > { %v1591_v57 = vpop.f32.mrf.mxu1  ;;  %4138 = vst [vmem:[#allocation28_spill] sm:$0xff] %v3581_v1  ;;  %v1731_v8 = vadd.f32 %v1685_v52, %v1634_v37 }
 0x229   : > { %v1508_v12 = vmax.f32 %v1479_v24, 0.0  ;;  %v1748_v50 = vmul.f32 %v1591_v57, %v4139_v18  ;;  %v1942_v32 = vmul.f32 %v1591_v57, %v4141_v19  ;;  %4143 = vst [vmem:[#allocation42_spill] sm:$0xff] %v3593_v54  ;;  %v2136_v22 = vmul.f32 %v1591_v57, %v2955_v17 }
 0x22a   : > { %v1651_v19 = vmul.f32 %v1591_v57, %v4144_v46  ;;  %v1879_v60 = vsel %vm827_vm4, %v3994_v44, %v1878_v30  ;;  %v2073_v17 = vsel %vm1151_vm0, %v3993_v23, %v2072_v16  ;;  %v4145_v46 = vld [vmem:[#allocation39_spill] sm:$0xff] }
 0x22b   : > { %v1781_v63 = vrot.slane %v1748_v50, 1  ;;  %2373 = vmatmul.msk.f32.gmra.mxu2 %vm1519_vm7, %v1508_v12  ;;  %v1975_v18 = vrot.slane %v1942_v32, 2  ;;  %v2169_v52 = vrot.slane %v2136_v22, 3  ;;  %v1845_v32 = vmul.f32 %v1591_v57, %v4145_v46 }
 0x22c   : > { %v1686_v50 = vrot.slane %v1651_v19, 7  ;;  %v4146_v19 = vld [vmem:[#allocation31_spill] sm:$0xff] }
 0x22d   : > { %v1782_v24 = vsel %vm663_vm2, %v1779_v59, %v1781_v63  ;;  %v1976_v37 = vsel %vm987_vm3, %v1973_v4, %v1975_v18 }
 0x22e   : > { %v1828_v42 = vadd.f32 %v1782_v24, %v1731_v8  ;;  %v2170_v24 = vsel %vm1311_vm5, %v2167_v13, %v2169_v52  ;;  %v1687_v4 = vsel %vm503_vm1, %v1684_v38, %v1686_v50  ;;  %v2039_v13 = vmul.f32 %v1591_v57, %v3001_v51 }
 0x230   : > { %v1925_v12 = vadd.f32 %v1879_v60, %v1828_v42 }
 0x232   : > { %v2022_v59 = vadd.f32 %v1976_v37, %v1925_v12  ;;  %v1635_v12 = vmul.f32 %v1591_v57, %v2649_v26  ;;  %v4147_v37 = vld [vmem:[#allocation32_spill] sm:$0xff] }
 0x234   : > { %v2119_v8 = vadd.f32 %v2073_v17, %v2022_v59  ;;  %v1880_v17 = vrot.slane %v1845_v32, 6  ;;  %v2074_v32 = vrot.slane %v2039_v13, 5 }
 0x235   : > { %v1594_v42 = vpop.f32.mrf.mxu1 }
 0x236   : > { %v2216_v22 = vadd.f32 %v2170_v24, %v2119_v8  ;;  %v1749_v60 = vmul.f32 %v1594_v42, %v4146_v19  ;;  %v1943_v59 = vmul.f32 %v1594_v42, %v4147_v37  ;;  %v1732_v24 = vadd.f32 %v1687_v4, %v1635_v12 }
 0x237   : > { %v2137_v44 = vmul.f32 %v1594_v42, %v2870_v53  ;;  %v1881_v37 = vsel %vm827_vm4, %v1878_v30, %v1880_v17  ;;  %v1652_v4 = vmul.f32 %v1594_v42, %v2716_v45 }
 0x238   : > { %v2236_v46 = vadd.f32 %v3611_v56, %v2216_v22  ;;  %v1783_v38 = vrot.slane %v1749_v60, 1  ;;  %v1481_v8 = vpop.f32.mrf.mxu3  ;;  %v1977_v23 = vrot.slane %v1943_v59, 2  ;;  %v2075_v60 = vsel %vm1151_vm0, %v2072_v16, %v2074_v32 }
 0x239   : > { %v1482_v26 = vadd.f32 %v3304_v6, %v1481_v8  ;;  %v2171_v22 = vrot.slane %v2137_v44, 3  ;;  %v1688_v59 = vrot.slane %v1652_v4, 7  ;;  %v1636_v16 = vmul.f32 %v1594_v42, %v2660_v29  ;;  %v4149_v4 = vld [vmem:[#allocation48_spill] sm:$0xff] }
 0x23a   : > { %2253 = vst.msk [vmem:[%s3620_s25 + $0x8] sm:$0xff] %vm2251_vm8, %v2236_v46  ;;  %v1784_v19 = vsel %vm663_vm2, %v1781_v63, %v1783_v38  ;;  %v1978_v57 = vsel %vm987_vm3, %v1975_v18, %v1977_v23 }
 0x23b   : > { %v1829_v54 = vadd.f32 %v1784_v19, %v1732_v24  ;;  %v1509_v1 = vmax.f32 %v1482_v26, 0.0  ;;  %v2172_v12 = vsel %vm1311_vm5, %v2169_v52, %v2171_v22  ;;  %v4148_v52 = vld [vmem:[#allocation47_spill] sm:$0xff]  ;;  %v2040_v26 = vmul.f32 %v1594_v42, %v3044_v49 }
 0x23d   : > { %v1926_v51 = vadd.f32 %v1881_v37, %v1829_v54  ;;  %2374 = vmatmul.msk.f32.gmra.mxu2 %vm1519_vm7, %v1509_v1  ;;  %v1846_v54 = vmul.f32 %v1594_v42, %v3029_v2  ;;  %v1689_v1 = vsel %vm503_vm1, %v1686_v50, %v1688_v59 }
 0x23e   : > { %v1733_v37 = vadd.f32 %v1689_v1, %v1636_v16 }
 0x23f   : > { %v2023_v63 = vadd.f32 %v1978_v57, %v1926_v51  ;;  %v1882_v19 = vrot.slane %v1846_v54, 6 }
 0x241   : > { %v2120_v53 = vadd.f32 %v2075_v60, %v2023_v63  ;;  %v1883_v60 = vsel %vm827_vm4, %v1880_v17, %v1882_v19 }
 0x243   : > { %v2217_v46 = vadd.f32 %v2172_v12, %v2120_v53  ;;  %v1484_v30 = vpop.f32.mrf.mxu3 }
 0x244   : > { %v1485_v13 = vadd.f32 %v3304_v6, %v1484_v30 }
 0x245   : > { %v2237_v44 = vadd.f32 %v3611_v56, %v2217_v46 }
 0x246   : > { %v1510_v18 = vmax.f32 %v1485_v13, 0.0  ;;  %v1597_v8 = vpop.f32.mrf.mxu1 }
 0x247   : > { %2254 = vst.msk [vmem:[%s3620_s25 + $0x10] sm:$0xff] %vm2251_vm8, %v2237_v44  ;;  %v1750_v45 = vmul.f32 %v1597_v8, %v2751_v55  ;;  %v1944_v24 = vmul.f32 %v1597_v8, %v4148_v52  ;;  %v2138_v50 = vmul.f32 %v1597_v8, %v4149_v4  ;;  %v2076_v55 = vrot.slane %v2040_v26, 5  ;;  %v4151_v52 = vld [vmem:[#allocation2_spill] sm:$0xff] }
 0x248   : > { %2375 = vmatmul.msk.f32.gmra.mxu2 %vm1519_vm7, %v1510_v18  ;;  %v1653_v29 = vmul.f32 %v1597_v8, %v2683_v36  ;;  %v1847_v44 = vmul.f32 %v1597_v8, %v3068_v31  ;;  %v4152_v26 = vld [vmem:[#allocation50_spill] sm:$0xff] }
 0x249   : > { %v1785_v2 = vrot.slane %v1750_v45, 1  ;;  %v1979_v57 = vrot.slane %v1944_v24, 2  ;;  %v2173_v46 = vrot.slane %v2138_v50, 3  ;;  %v2077_v49 = vsel %vm1151_vm0, %v2074_v32, %v2076_v55  ;;  %v4150_v45 = vld [vmem:[#allocation51_spill] sm:$0xff] }
 0x24a   : > { %v1690_v13 = vrot.slane %v1653_v29, 7  ;;  %v1637_v24 = vmul.f32 %v1597_v8, %v4151_v52 }
 0x24b   : > { %v1786_v51 = vsel %vm663_vm2, %v1783_v38, %v1785_v2  ;;  %v1980_v12 = vsel %vm987_vm3, %v1977_v23, %v1979_v57  ;;  %v2174_v38 = vsel %vm1311_vm5, %v2171_v22, %v2173_v46 }
 0x24c   : > { %v1830_v63 = vadd.f32 %v1786_v51, %v1733_v37  ;;  %v1691_v23 = vsel %vm503_vm1, %v1688_v59, %v1690_v13  ;;  %v1884_v37 = vrot.slane %v1847_v44, 6  ;;  %v4153_v51 = vld [vmem:[#allocation52_spill] sm:$0xff] }
 0x24d   : > { %v2041_v31 = vmul.f32 %v1597_v8, %v4153_v51  ;;  %v1734_v50 = vadd.f32 %v1691_v23, %v1637_v24 }
 0x24e   : > { %v1927_v53 = vadd.f32 %v1883_v60, %v1830_v63  ;;  %v1885_v29 = vsel %vm827_vm4, %v1882_v19, %v1884_v37 }
 0x250   : > { %v2024_v30 = vadd.f32 %v1980_v12, %v1927_v53  ;;  %v2078_v12 = vrot.slane %v2041_v31, 5  ;;  %v4154_v31 = vld [vmem:[#allocation53_spill] sm:$0xff] }
 0x252   : > { %v2121_v42 = vadd.f32 %v2077_v49, %v2024_v30  ;;  %v2079_v8 = vsel %vm1151_vm0, %v2076_v55, %v2078_v12 }
 0x254   : > { %v2218_v54 = vadd.f32 %v2174_v38, %v2121_v42 }
 0x255   : > { %v1487_v18 = vpop.f32.mrf.mxu3 }
 0x256   : > { %v2238_v17 = vadd.f32 %v3611_v56, %v2218_v54  ;;  %v1488_v1 = vadd.f32 %v3304_v6, %v1487_v18  ;;  %v1600_v36 = vpop.f32.mrf.mxu1 }
 0x257   : > { %v1751_v16 = vmul.f32 %v1600_v36, %v4150_v45  ;;  %v1945_v22 = vmul.f32 %v1600_v36, %v4152_v26  ;;  %v2139_v59 = vmul.f32 %v1600_v36, %v3052_v58  ;;  %v1848_v23 = vmul.f32 %v1600_v36, %v2945_v25 }
 0x258   : > { %2255 = vst.msk [vmem:[%s3620_s25 + $0x18] sm:$0xff] %vm2251_vm8, %v2238_v17  ;;  %v1511_v32 = vmax.f32 %v1488_v1, 0.0  ;;  %v1654_v1 = vmul.f32 %v1600_v36, %v2726_v47  ;;  %v2042_v47 = vmul.f32 %v1600_v36, %v3073_v7 }
 0x259   : > { %v1787_v4 = vrot.slane %v1751_v16, 1  ;;  %v1981_v60 = vrot.slane %v1945_v22, 2  ;;  %v2175_v42 = vrot.slane %v2139_v59, 3  ;;  %v1638_v16 = vmul.f32 %v1600_v36, %v2633_v21 }
 0x25a   : > { %2376 = vmatmul.msk.f32.gmra.mxu2 %vm1519_vm7, %v1511_v32  ;;  %v1886_v24 = vrot.slane %v1848_v23, 6 }
 0x25b   : > { %v1788_v63 = vsel %vm663_vm2, %v1785_v2, %v1787_v4  ;;  %v1982_v49 = vsel %vm987_vm3, %v1979_v57, %v1981_v60  ;;  %v2176_v18 = vsel %vm1311_vm5, %v2173_v46, %v2175_v42  ;;  %v1692_v57 = vrot.slane %v1654_v1, 7 }
 0x25c   : > { %v1831_v53 = vadd.f32 %v1788_v63, %v1734_v50  ;;  %v1887_v63 = vsel %vm827_vm4, %v1884_v37, %v1886_v24 }
 0x25d   : > { %v1693_v45 = vsel %vm503_vm1, %v1690_v13, %v1692_v57  ;;  %v2080_v13 = vrot.slane %v2042_v47, 5 }
 0x25e   : > { %v1928_v30 = vadd.f32 %v1885_v29, %v1831_v53  ;;  %v1735_v26 = vadd.f32 %v1693_v45, %v1638_v16 }
 0x25f   : > { %v2081_v7 = vsel %vm1151_vm0, %v2078_v12, %v2080_v13 }
 0x260   : > { %v2025_v38 = vadd.f32 %v1982_v49, %v1928_v30 }
 0x262   : > { %v2122_v54 = vadd.f32 %v2079_v8, %v2025_v38  ;;  %v1490_v44 = vpop.f32.mrf.mxu3 }
 0x263   : > { %v1491_v2 = vadd.f32 %v3304_v6, %v1490_v44 }
 0x264   : > { %v2219_v17 = vadd.f32 %v2176_v18, %v2122_v54 }
 0x265   : > { %v1512_v58 = vmax.f32 %v1491_v2, 0.0 }
 0x266   : > { %v2239_v19 = vadd.f32 %v3611_v56, %v2219_v17 }
 0x267   : > { %2377 = vmatmul.msk.f32.gmra.mxu2 %vm1519_vm7, %v1512_v58 }
 0x268   : > { %2256 = vst.msk [vmem:[%s3620_s25 + $0x20] sm:$0xff] %vm2251_vm8, %v2239_v19 }
 0x26d   : > { %v1603_v55 = vpop.f32.mrf.mxu1 }
 0x26e   : > { %v1752_v46 = vmul.f32 %v1603_v55, %v3089_v9  ;;  %v1946_v52 = vmul.f32 %v1603_v55, %v3108_v11  ;;  %v2140_v50 = vmul.f32 %v1603_v55, %v4154_v31  ;;  %v1655_v36 = vmul.f32 %v1603_v55, %v2694_v39 }
 0x26f   : > { %v2043_v58 = vmul.f32 %v1603_v55, %v3122_v41 }
 0x270   : > { %v1789_v32 = vrot.slane %v1752_v46, 1  ;;  %v1983_v51 = vrot.slane %v1946_v52, 2  ;;  %v2177_v9 = vrot.slane %v2140_v50, 3  ;;  %v1694_v37 = vrot.slane %v1655_v36, 7 }
 0x272   : > { %v1790_v22 = vsel %vm663_vm2, %v1787_v4, %v1789_v32  ;;  %v1984_v21 = vsel %vm987_vm3, %v1981_v60, %v1983_v51  ;;  %v2178_v30 = vsel %vm1311_vm5, %v2175_v42, %v2177_v9  ;;  %v1849_v60 = vmul.f32 %v1603_v55, %v2987_v0 }
 0x273   : > { %v1832_v25 = vadd.f32 %v1790_v22, %v1735_v26  ;;  %v1695_v39 = vsel %vm503_vm1, %v1692_v57, %v1694_v37  ;;  %v1639_v42 = vmul.f32 %v1603_v55, %v2673_v34  ;;  %v2082_v34 = vrot.slane %v2043_v58, 5 }
 0x274   : > { %v1888_v17 = vrot.slane %v1849_v60, 6  ;;  %v4161_v60 = vld [vmem:[#allocation21_spill] sm:$0xff] }
 0x275   : > { %v1929_v59 = vadd.f32 %v1887_v63, %v1832_v25  ;;  %v1736_v0 = vadd.f32 %v1695_v39, %v1639_v42  ;;  %v2083_v55 = vsel %vm1151_vm0, %v2080_v13, %v2082_v34  ;;  %v4156_v25 = vld [vmem:[#allocation38_spill] sm:$0xff] }
 0x277   : > { %v2026_v11 = vadd.f32 %v1984_v21, %v1929_v59  ;;  %v1493_v53 = vpop.f32.mrf.mxu3  ;;  %v4157_v59 = vld [vmem:[#allocation8_spill] sm:$0xff] }
 0x278   : > { %v1494_v4 = vadd.f32 %v3304_v6, %v1493_v53  ;;  %v4158_v21 = vld [vmem:[#allocation56_spill] sm:$0xff]  ;;  %v4159_v53 = vld [vmem:[#allocation54_spill] sm:$0xff] }
 0x279   : > { %v2123_v29 = vadd.f32 %v2081_v7, %v2026_v11 }
 0x27a   : > { %v1513_v49 = vmax.f32 %v1494_v4, 0.0 }
 0x27b   : > { %v2220_v38 = vadd.f32 %v2178_v30, %v2123_v29 }
 0x27c   : > { %2378 = vmatmul.msk.f32.gmra.mxu2 %vm1519_vm7, %v1513_v49  ;;  %v4160_v49 = vld [vmem:[#allocation58_spill] sm:$0xff] }
 0x27d   : > { %v2240_v8 = vadd.f32 %v3611_v56, %v2220_v38 }
 0x27f   : > { %2257 = vst.msk [vmem:[%s3620_s25 + $0x28] sm:$0xff] %vm2251_vm8, %v2240_v8  ;;  %v1496_v54 = vpop.f32.mrf.mxu3  ;;  %v1606_v12 = vpop.f32.mrf.mxu1 }
 0x280   : > { %v1497_v44 = vadd.f32 %v3304_v6, %v1496_v54  ;;  %v1753_v18 = vmul.f32 %v1606_v12, %v3130_v61  ;;  %v1947_v2 = vmul.f32 %v1606_v12, %v3150_v15  ;;  %v2141_v57 = vmul.f32 %v1606_v12, %v3168_v3  ;;  %v4155_v3 = vld [vmem:[#allocation19_spill] sm:$0xff] }
 0x281   : > { %v1889_v61 = vsel %vm827_vm4, %v1886_v24, %v1888_v17  ;;  %v1656_v22 = vmul.f32 %v1606_v12, %v4155_v3  ;;  %v1850_v24 = vmul.f32 %v1606_v12, %v3144_v35  ;;  %v1640_v13 = vmul.f32 %v1606_v12, %v4157_v59 }
 0x282   : > { %v1514_v1 = vmax.f32 %v1497_v44, 0.0  ;;  %v1791_v19 = vrot.slane %v1753_v18, 1  ;;  %v1985_v45 = vrot.slane %v1947_v2, 2  ;;  %v2179_v16 = vrot.slane %v2141_v57, 3 }
 0x283   : > { %v1696_v31 = vrot.slane %v1656_v22, 7  ;;  %v2044_v7 = vmul.f32 %v1606_v12, %v4159_v53 }
 0x284   : > { %v1792_v23 = vsel %vm663_vm2, %v1789_v32, %v1791_v19  ;;  %2379 = vmatmul.msk.f32.gmra.mxu2 %vm1519_vm7, %v1514_v1  ;;  %v1986_v15 = vsel %vm987_vm3, %v1983_v51, %v1985_v45  ;;  %v2180_v47 = vsel %vm1311_vm5, %v2177_v9, %v2179_v16  ;;  %v1890_v9 = vrot.slane %v1850_v24, 6  ;;  %v4162_v1 = vld [vmem:[#allocation49_spill] sm:$0xff] }
 0x285   : > { %v1833_v6 = vadd.f32 %v1792_v23, %v1736_v0  ;;  %v1697_v51 = vsel %vm503_vm1, %v1694_v37, %v1696_v31  ;;  %v2084_v37 = vrot.slane %v2044_v7, 5 }
 0x286   : > { %v1737_v4 = vadd.f32 %v1697_v51, %v1640_v13  ;;  %v1891_v8 = vsel %vm827_vm4, %v1888_v17, %v1890_v9 }
 0x287   : > { %v1930_v46 = vadd.f32 %v1889_v61, %v1833_v6  ;;  %v2085_v12 = vsel %vm1151_vm0, %v2082_v34, %v2084_v37  ;;  %v4163_v6 = vld [vmem:[#allocation41_spill] sm:$0xff] }
 0x289   : > { %v2027_v41 = vadd.f32 %v1986_v15, %v1930_v46  ;;  %v4164_v46 = vld [vmem:[#allocation3_spill] sm:$0xff] }
 0x28b   : > { %v2124_v52 = vadd.f32 %v2083_v55, %v2027_v41  ;;  %v4165_v41 = vld [vmem:[#allocation57_spill] sm:$0xff] }
 0x28d   : > { %v2221_v32 = vadd.f32 %v2180_v47, %v2124_v52  ;;  %v4166_v52 = vld [vmem:[#allocation59_spill] sm:$0xff] }
 0x28f   : > { %v2241_v26 = vadd.f32 %v3611_v56, %v2221_v32 }
 0x291   : > { %2258 = vst.msk [vmem:[%s3620_s25 + $0x30] sm:$0xff] %vm2251_vm8, %v2241_v26 }
 0x2a0   : > { %v1609_v50 = vpop.f32.mrf.mxu2 }
 0x2a1   : > { %v1754_v63 = vmul.f32 %v1609_v50, %v4156_v25  ;;  %v1948_v11 = vmul.f32 %v1609_v50, %v4158_v21  ;;  %v2142_v38 = vmul.f32 %v1609_v50, %v4160_v49  ;;  %v1657_v54 = vmul.f32 %v1609_v50, %v4161_v60  ;;  %v4167_v21 = vld [vmem:[#allocation14_spill] sm:$0xff] }
 0x2a2   : > { %v1641_v15 = vmul.f32 %v1609_v50, %v4164_v46  ;;  %v2045_v47 = vmul.f32 %v1609_v50, %v4166_v52  ;;  %v4171_v60 = vld [vmem:[#allocation62_spill] sm:$0xff]  ;;  %v4173_v46 = vld [vmem:[#allocation63_spill] sm:$0xff] }
 0x2a3   : > { %v1793_v36 = vrot.slane %v1754_v63, 1  ;;  %v1987_v30 = vrot.slane %v1948_v11, 2  ;;  %v2181_v18 = vrot.slane %v2142_v38, 3  ;;  %v1698_v2 = vrot.slane %v1657_v54, 7  ;;  %v4169_v38 = vld [vmem:[#allocation55_spill] sm:$0xff] }
 0x2a4   : > { %v2086_v51 = vrot.slane %v2045_v47, 5  ;;  %v4174_v47 = vld [vmem:[#allocation61_spill] sm:$0xff] }
 0x2a5   : > { %v1794_v29 = vsel %vm663_vm2, %v1791_v19, %v1793_v36  ;;  %v1988_v44 = vsel %vm987_vm3, %v1985_v45, %v1987_v30  ;;  %v1851_v19 = vmul.f32 %v1609_v50, %v4162_v1  ;;  %v2182_v0 = vsel %vm1311_vm5, %v2179_v16, %v2181_v18 }
 0x2a6   : > { %v1834_v35 = vadd.f32 %v1794_v29, %v1737_v4  ;;  %v1699_v17 = vsel %vm503_vm1, %v1696_v31, %v1698_v2  ;;  %v2087_v50 = vsel %vm1151_vm0, %v2084_v37, %v2086_v51  ;;  %v4168_v29 = vld [vmem:[#allocation60_spill] sm:$0xff] }
 0x2a7   : > { %v1892_v34 = vrot.slane %v1851_v19, 6  ;;  %v1738_v26 = vadd.f32 %v1699_v17, %v1641_v15 }
 0x2a8   : > { %v1931_v39 = vadd.f32 %v1891_v8, %v1834_v35  ;;  %v4170_v8 = vld [vmem:[#allocation11_spill] sm:$0xff] }
 0x2a9   : > { %v1893_v24 = vsel %vm827_vm4, %v1890_v9, %v1892_v34 }
 0x2aa   : > { %v2028_v42 = vadd.f32 %v1988_v44, %v1931_v39  ;;  %v4172_v44 = vld [vmem:[#allocation64_spill] sm:$0xff] }
 0x2ac   : > { %v2125_v58 = vadd.f32 %v2085_v12, %v2028_v42 }
 0x2ae   : > { %v2222_v23 = vadd.f32 %v2182_v0, %v2125_v58  ;;  %v1612_v57 = vpop.f32.mrf.mxu2 }
 0x2af   : > { %v1755_v61 = vmul.f32 %v1612_v57, %v4163_v6  ;;  %v1949_v55 = vmul.f32 %v1612_v57, %v4165_v41  ;;  %v2143_v22 = vmul.f32 %v1612_v57, %v3299_v43  ;;  %v1658_v11 = vmul.f32 %v1612_v57, %v4167_v21 }
 0x2b0   : > { %v2242_v45 = vadd.f32 %v3611_v56, %v2222_v23  ;;  %v1852_v49 = vmul.f32 %v1612_v57, %v4168_v29  ;;  %v1642_v37 = vmul.f32 %v1612_v57, %v4170_v8 }
 0x2b1   : > { %v1795_v32 = vrot.slane %v1755_v61, 1  ;;  %v1989_v3 = vrot.slane %v1949_v55, 2  ;;  %v2183_v59 = vrot.slane %v2143_v22, 3  ;;  %v1700_v4 = vrot.slane %v1658_v11, 7  ;;  %v4178_v11 = vld [vmem:[#allocation69_spill] sm:$0xff] }
 0x2b2   : > { %2259 = vst.msk [vmem:[%s3620_s25 + $0x38] sm:$0xff] %vm2251_vm8, %v2242_v45  ;;  %v1894_v39 = vrot.slane %v1852_v49, 6 }
 0x2b3   : > { %v1796_v16 = vsel %vm663_vm2, %v1793_v36, %v1795_v32  ;;  %v1990_v63 = vsel %vm987_vm3, %v1987_v30, %v1989_v3  ;;  %v2184_v7 = vsel %vm1311_vm5, %v2181_v18, %v2183_v59  ;;  %v1701_v30 = vsel %vm503_vm1, %v1698_v2, %v1700_v4 }
 0x2b4   : > { %v1835_v31 = vadd.f32 %v1796_v16, %v1738_v26  ;;  %v2046_v18 = vmul.f32 %v1612_v57, %v4172_v44  ;;  %v1739_v58 = vadd.f32 %v1701_v30, %v1642_v37  ;;  %v1895_v2 = vsel %vm827_vm4, %v1892_v34, %v1894_v39  ;;  %v4176_v16 = vld [vmem:[#allocation22_spill] sm:$0xff] }
 0x2b6   : > { %v1932_v25 = vadd.f32 %v1893_v24, %v1835_v31  ;;  %v2088_v17 = vrot.slane %v2046_v18, 5  ;;  %v4177_v24 = vld [vmem:[#allocation66_spill] sm:$0xff] }
 0x2b8   : > { %v2029_v13 = vadd.f32 %v1990_v63, %v1932_v25  ;;  %v2089_v55 = vsel %vm1151_vm0, %v2086_v51, %v2088_v17 }
 0x2ba   : > { %v2126_v53 = vadd.f32 %v2087_v50, %v2029_v13 }
 0x2bc   : > { %v2223_v36 = vadd.f32 %v2184_v7, %v2126_v53 }
 0x2be   : > { %v2243_v43 = vadd.f32 %v3611_v56, %v2223_v36 }
 0x2c0   : > { %2260 = vst.msk [vmem:[%s3620_s25 + $0x40] sm:$0xff] %vm2251_vm8, %v2243_v43  ;;  %v1615_v9 = vpop.f32.mrf.mxu2 }
 0x2c1   : > { %v1756_v35 = vmul.f32 %v1615_v9, %v4169_v38  ;;  %v1950_v54 = vmul.f32 %v1615_v9, %v4171_v60  ;;  %v1659_v42 = vmul.f32 %v1615_v9, %v4083_v10  ;;  %v2144_v0 = vmul.f32 %v1615_v9, %v3323_v28  ;;  %v4175_v28 = vld [vmem:[#allocation10_spill] sm:$0xff]  ;;  %v4179_v38 = vld [vmem:[#allocation24_spill] sm:$0xff] }
 0x2c2   : > { %v1853_v15 = vmul.f32 %v1615_v9, %v4173_v46  ;;  %v1643_v26 = vmul.f32 %v1615_v9, %v4175_v28  ;;  %v2047_v25 = vmul.f32 %v1615_v9, %v4177_v24  ;;  %v4186_v24 = vld [vmem:[#allocation73_spill] sm:$0xff] }
 0x2c3   : > { %v1797_v12 = vrot.slane %v1756_v35, 1  ;;  %v1991_v19 = vrot.slane %v1950_v54, 2  ;;  %v1702_v6 = vrot.slane %v1659_v42, 7  ;;  %v2185_v57 = vrot.slane %v2144_v0, 3  ;;  %v4182_v0 = vld [vmem:[#allocation68_spill] sm:$0xff] }
 0x2c4   : > { %v1896_v31 = vrot.slane %v1853_v15, 6  ;;  %v2090_v43 = vrot.slane %v2047_v25, 5 }
 0x2c5   : > { %v1798_v1 = vsel %vm663_vm2, %v1795_v32, %v1797_v12  ;;  %v1992_v45 = vsel %vm987_vm3, %v1989_v3, %v1991_v19  ;;  %v1703_v52 = vsel %vm503_vm1, %v1700_v4, %v1702_v6  ;;  %v2186_v3 = vsel %vm1311_vm5, %v2183_v59, %v2185_v57 }
 0x2c6   : > { %v1836_v23 = vadd.f32 %v1798_v1, %v1739_v58  ;;  %v1740_v13 = vadd.f32 %v1703_v52, %v1643_v26  ;;  %v1897_v4 = vsel %vm827_vm4, %v1894_v39, %v1896_v31  ;;  %v2091_v30 = vsel %vm1151_vm0, %v2088_v17, %v2090_v43  ;;  %v4180_v39 = vld [vmem:[#allocation67_spill] sm:$0xff]  ;;  %v4181_v58 = vld [vmem:[#allocation65_spill] sm:$0xff] }
 0x2c7   : > { %v4183_v17 = vld [vmem:[#allocation71_spill] sm:$0xff]  ;;  %v4185_v52 = vld [vmem:[#allocation17_spill] sm:$0xff] }
 0x2c8   : > { %v1933_v61 = vadd.f32 %v1895_v2, %v1836_v23 }
 0x2ca   : > { %v2030_v41 = vadd.f32 %v1992_v45, %v1933_v61 }
 0x2cb   : > { %v1618_v10 = vpop.f32.mrf.mxu2 }
 0x2cc   : > { %v1757_v32 = vmul.f32 %v1618_v10, %v4174_v47  ;;  %v2127_v34 = vadd.f32 %v2089_v55, %v2030_v41  ;;  %v1951_v22 = vmul.f32 %v1618_v10, %v4176_v16  ;;  %v2145_v53 = vmul.f32 %v1618_v10, %v4178_v11  ;;  %v4184_v41 = vld [vmem:[#allocation4_spill] sm:$0xff] }
 0x2cd   : > { %v1660_v35 = vmul.f32 %v1618_v10, %v4179_v38  ;;  %v1854_v18 = vmul.f32 %v1618_v10, %v4180_v39  ;;  %v2048_v61 = vmul.f32 %v1618_v10, %v4183_v17 }
 0x2ce   : > { %v1799_v63 = vrot.slane %v1757_v32, 1  ;;  %v2224_v50 = vadd.f32 %v2186_v3, %v2127_v34  ;;  %v1993_v21 = vrot.slane %v1951_v22, 2  ;;  %v2187_v49 = vrot.slane %v2145_v53, 3  ;;  %v4188_v53 = vld [vmem:[#allocation13_spill] sm:$0xff] }
 0x2cf   : > { %v1704_v54 = vrot.slane %v1660_v35, 7  ;;  %v1898_v2 = vrot.slane %v1854_v18, 6  ;;  %v2092_v28 = vrot.slane %v2048_v61, 5  ;;  %v4191_v35 = vld [vmem:[#allocation75_spill] sm:$0xff] }
 0x2d0   : > { %v1800_v51 = vsel %vm663_vm2, %v1797_v12, %v1799_v63  ;;  %v2244_v7 = vadd.f32 %v3611_v56, %v2224_v50  ;;  %v1994_v59 = vsel %vm987_vm3, %v1991_v19, %v1993_v21  ;;  %v2188_v37 = vsel %vm1311_vm5, %v2185_v57, %v2187_v49 }
 0x2d1   : > { %v1837_v36 = vadd.f32 %v1800_v51, %v1740_v13  ;;  %v1705_v12 = vsel %vm503_vm1, %v1702_v6, %v1704_v54  ;;  %v1644_v19 = vmul.f32 %v1618_v10, %v4094_v14  ;;  %v1899_v6 = vsel %vm827_vm4, %v1896_v31, %v1898_v2  ;;  %v4187_v31 = vld [vmem:[#allocation70_spill] sm:$0xff] }
 0x2d2   : > { %2261 = vst.msk [vmem:[%s3620_s25 + $0x48] sm:$0xff] %vm2251_vm8, %v2244_v7  ;;  %v2093_v10 = vsel %vm1151_vm0, %v2090_v43, %v2092_v28 }
 0x2d3   : > { %v1934_v29 = vadd.f32 %v1897_v4, %v1837_v36  ;;  %v1741_v15 = vadd.f32 %v1705_v12, %v1644_v19  ;;  %v4192_v19 = vld [vmem:[#allocation25_spill] sm:$0xff] }
 0x2d5   : > { %v2031_v9 = vadd.f32 %v1994_v59, %v1934_v29  ;;  %v4190_v29 = vld [vmem:[#allocation76_spill] sm:$0xff] }
 0x2d7   : > { %v2128_v8 = vadd.f32 %v2091_v30, %v2031_v9 }
 0x2d9   : > { %v2225_v60 = vadd.f32 %v2188_v37, %v2128_v8 }
 0x2db   : > { %v2245_v44 = vadd.f32 %v3611_v56, %v2225_v60 }
 0x2dd   : > { %2262 = vst.msk [vmem:[%s3620_s25 + $0x50] sm:$0xff] %vm2251_vm8, %v2245_v44  ;;  %v1621_v42 = vpop.f32.mrf.mxu2 }
 0x2de   : > { %v1758_v1 = vmul.f32 %v1621_v42, %v4181_v58  ;;  %v1952_v23 = vmul.f32 %v1621_v42, %v4182_v0  ;;  %v2146_v55 = vmul.f32 %v1621_v42, %v4184_v41  ;;  %v1661_v47 = vmul.f32 %v1621_v42, %v4185_v52  ;;  %v4194_v41 = vld [vmem:[#allocation26_spill] sm:$0xff] }
 0x2df   : > { %v1855_v25 = vmul.f32 %v1621_v42, %v4186_v24  ;;  %v1645_v7 = vmul.f32 %v1621_v42, %v4188_v53  ;;  %v2049_v59 = vmul.f32 %v1621_v42, %v4190_v29  ;;  %v4195_v52 = vld [vmem:[#allocation74_spill] sm:$0xff] }
 0x2e0   : > { %v1801_v46 = vrot.slane %v1758_v1, 1  ;;  %v1995_v57 = vrot.slane %v1952_v23, 2  ;;  %v2189_v34 = vrot.slane %v2146_v55, 3  ;;  %v1706_v16 = vrot.slane %v1661_v47, 7 }
 0x2e1   : > { %v1900_v4 = vrot.slane %v1855_v25, 6 }
 0x2e2   : > { %v1802_v45 = vsel %vm663_vm2, %v1799_v63, %v1801_v46  ;;  %v1996_v14 = vsel %vm987_vm3, %v1993_v21, %v1995_v57  ;;  %v2190_v63 = vsel %vm1311_vm5, %v2187_v49, %v2189_v34  ;;  %v1707_v50 = vsel %vm503_vm1, %v1704_v54, %v1706_v16  ;;  %v4189_v21 = vld [vmem:[#allocation72_spill] sm:$0xff] }
 0x2e3   : > { %v1838_v32 = vadd.f32 %v1802_v45, %v1741_v15  ;;  %v1742_v30 = vadd.f32 %v1707_v50, %v1645_v7  ;;  %v1901_v60 = vsel %vm827_vm4, %v1898_v2, %v1900_v4  ;;  %v2094_v54 = vrot.slane %v2049_v59, 5  ;;  %v4199_v50 = vld [vmem:[#allocation82_spill] sm:$0xff] }
 0x2e5   : > { %v1935_v26 = vadd.f32 %v1899_v6, %v1838_v32  ;;  %v2095_v12 = vsel %vm1151_vm0, %v2092_v28, %v2094_v54  ;;  %v4196_v32 = vld [vmem:[#allocation12_spill] sm:$0xff]  ;;  %v4197_v28 = vld [vmem:[#allocation77_spill] sm:$0xff] }
 0x2e7   : > { %v2032_v22 = vadd.f32 %v1996_v14, %v1935_v26 }
 0x2e9   : > { %v2129_v3 = vadd.f32 %v2093_v10, %v2032_v22  ;;  %v4198_v10 = vld [vmem:[#allocation79_spill] sm:$0xff] }
 0x2ea   : > { %v1624_v13 = vpop.f32.mrf.mxu2 }
 0x2eb   : > { %v2226_v51 = vadd.f32 %v2190_v63, %v2129_v3  ;;  %v1759_v11 = vmul.f32 %v1624_v13, %v4187_v31  ;;  %v1953_v36 = vmul.f32 %v1624_v13, %v4189_v21  ;;  %v2147_v8 = vmul.f32 %v1624_v13, %v4191_v35  ;;  %v4200_v31 = vld [vmem:[#allocation5_spill] sm:$0xff] }
 0x2ec   : > { %v1662_v0 = vmul.f32 %v1624_v13, %v4192_v19  ;;  %v1856_v2 = vmul.f32 %v1624_v13, %v3464_v33  ;;  %v1646_v6 = vmul.f32 %v1624_v13, %v4196_v32  ;;  %v4206_v19 = vld [vmem:[#allocation27_spill] sm:$0xff] }
 0x2ed   : > { %v2246_v43 = vadd.f32 %v3611_v56, %v2226_v51  ;;  %v1803_v9 = vrot.slane %v1759_v11, 1  ;;  %v1997_v38 = vrot.slane %v1953_v36, 2  ;;  %v2191_v18 = vrot.slane %v2147_v8, 3  ;;  %v4201_v36 = vld [vmem:[#allocation6_spill] sm:$0xff]  ;;  %v4203_v8 = vld [vmem:[#allocation80_spill] sm:$0xff] }
 0x2ee   : > { %v1708_v61 = vrot.slane %v1662_v0, 7  ;;  %v1902_v14 = vrot.slane %v1856_v2, 6 }
 0x2ef   : > { %2263 = vst.msk [vmem:[%s3620_s25 + $0x58] sm:$0xff] %vm2251_vm8, %v2246_v43  ;;  %v1804_v49 = vsel %vm663_vm2, %v1801_v46, %v1803_v9  ;;  %v1998_v39 = vsel %vm987_vm3, %v1995_v57, %v1997_v38  ;;  %v2192_v1 = vsel %vm1311_vm5, %v2189_v34, %v2191_v18  ;;  %v4193_v46 = vld [vmem:[#allocation78_spill] sm:$0xff] }
 0x2f0   : > { %v1839_v37 = vadd.f32 %v1804_v49, %v1742_v30  ;;  %v3812_v15 = vmul.f32 %v1624_v13, %v4193_v46  ;;  %v1709_v57 = vsel %vm503_vm1, %v1706_v16, %v1708_v61  ;;  %v1633_v13 = vmul.f32 %v3534_v27, %v4200_v31  ;;  %v4202_v49 = vld [vmem:[#allocation20_spill] sm:$0xff] }
 0x2f1   : > { %v1743_v33 = vadd.f32 %v1709_v57, %v1646_v6  ;;  %v1903_v11 = vsel %vm827_vm4, %v1900_v4, %v1902_v14  ;;  %v4208_v46 = vrot.slane %v3556_v20, 7  ;;  %v4209_v6 = vrot.slane %v3540_v5, 1 }
 0x2f2   : > { %v1936_v44 = vadd.f32 %v1901_v60, %v1839_v37  ;;  %v2096_v25 = vrot.slane %v3812_v15, 5  ;;  %v4204_v37 = vld [vmem:[#allocation34_spill] sm:$0xff] }
 0x2f4   : > { %v2033_v42 = vadd.f32 %v1998_v39, %v1936_v44  ;;  %v2097_v21 = vsel %vm1151_vm0, %v2094_v54, %v2096_v25 }
 0x2f6   : > { %v2130_v58 = vadd.f32 %v2095_v12, %v2033_v42  ;;  %v4205_v42 = vld [vmem:[#allocation81_spill] sm:$0xff] }
 0x2f8   : > { %v2227_v23 = vadd.f32 %v2192_v1, %v2130_v58 }
 0x2fa   : > { %v2247_v17 = vadd.f32 %v3611_v56, %v2227_v23  ;;  %v4207_v23 = vld [vmem:[#allocation15_spill] sm:$0xff] }
 0x2fc   : > { %2264 = vst.msk [vmem:[%s3620_s25 + $0x60] sm:$0xff] %vm2251_vm8, %v2247_v17 }
 0x2ff   : > { %v1627_v45 = vpop.f32.mrf.mxu2 }
 0x300   : > { %v1663_v55 = vmul.f32 %v1627_v45, %v4194_v41  ;;  %v1760_v47 = vmul.f32 %v1627_v45, %v4195_v52  ;;  %v1954_v26 = vmul.f32 %v1627_v45, %v4197_v28  ;;  %v3820_v24 = vmul.f32 %v1627_v45, %v4198_v10 }
 0x301   : > { %v1857_v51 = vmul.f32 %v1627_v45, %v4199_v50  ;;  %v1647_v29 = vmul.f32 %v1627_v45, %v4201_v36  ;;  %v2051_v43 = vmul.f32 %v1627_v45, %v3498_v62 }
 0x302   : > { %v1710_v34 = vrot.slane %v1663_v55, 7  ;;  %v1805_v22 = vrot.slane %v1760_v47, 1  ;;  %v1999_v16 = vrot.slane %v1954_v26, 2  ;;  %v2193_v7 = vrot.slane %v3820_v24, 3  ;;  %v4210_v24 = vld [vmem:[#allocation28_spill] sm:$0xff] }
 0x303   : > { %v1904_v44 = vrot.slane %v1857_v51, 6  ;;  %v2098_v32 = vrot.slane %v2051_v43, 5 }
 0x304   : > { %v1806_v3 = vsel %vm663_vm2, %v1803_v9, %v1805_v22  ;;  %v1711_v53 = vsel %vm503_vm1, %v1708_v61, %v1710_v34  ;;  %v2000_v30 = vsel %vm987_vm3, %v1997_v38, %v1999_v16  ;;  %v2194_v54 = vsel %vm1311_vm5, %v2191_v18, %v2193_v7 }
 0x305   : > { %v1840_v63 = vadd.f32 %v1806_v3, %v1743_v33  ;;  %v1744_v60 = vadd.f32 %v1711_v53, %v1647_v29  ;;  %v1905_v47 = vsel %vm827_vm4, %v1902_v14, %v1904_v44  ;;  %v4211_v33 = vrot.slane %v4210_v24, 6  ;;  %v4214_v53 = vld [vmem:[#allocation44_spill] sm:$0xff] }
 0x306   : > { %v2099_v31 = vsel %vm1151_vm0, %v2096_v25, %v2098_v32 }
 0x307   : > { %v1937_v59 = vadd.f32 %v1903_v11, %v1840_v63  ;;  %v1630_v9 = vpop.f32.mrf.mxu2 }
 0x308   : > { %v1664_v35 = vmul.f32 %v1630_v9, %v4202_v49  ;;  %v1761_v27 = vmul.f32 %v1630_v9, %v4203_v8  ;;  %v1858_v4 = vmul.f32 %v1630_v9, %v4204_v37  ;;  %v1955_v12 = vmul.f32 %v1630_v9, %v4205_v42  ;;  %v4217_v8 = vld [vmem:[#allocation43_spill] sm:$0xff] }
 0x309   : > { %v2034_v39 = vadd.f32 %v2000_v30, %v1937_v59  ;;  %v2052_v62 = vmul.f32 %v1630_v9, %v4206_v19  ;;  %v1648_v38 = vmul.f32 %v1630_v9, %v4207_v23  ;;  %v2149_v61 = vmul.f32 %v1630_v9, %v3512_v40  ;;  %v4215_v59 = vld [vmem:[#allocation42_spill] sm:$0xff] }
 0x30a   : > { %v1666_v58 = vrot.slane %v1664_v35, 7  ;;  %v1807_v1 = vrot.slane %v1761_v27, 1  ;;  %v1860_v17 = vrot.slane %v1858_v4, 6  ;;  %v2001_v57 = vrot.slane %v1955_v12, 2  ;;  %v4219_v4 = vld [vmem:[#allocation35_spill] sm:$0xff] }
 0x30b   : > { %v2131_v0 = vadd.f32 %v2097_v21, %v2034_v39  ;;  %v2054_v28 = vrot.slane %v2052_v62, 5  ;;  %v2195_v63 = vrot.slane %v2149_v61, 3  ;;  %v4216_v43 = vrot.slane %v4215_v59, 5 }
 0x30c   : > { %v1712_v2 = vsel %vm503_vm1, %v1710_v34, %v1666_v58  ;;  %v1729_v15 = vsel %vm503_vm1, %v1666_v58, %v4208_v46  ;;  %v1808_v45 = vsel %vm663_vm2, %v1805_v22, %v1807_v1  ;;  %v1826_v40 = vsel %vm663_vm2, %v1807_v1, %v4209_v6 }
 0x30d   : > { %v2228_v18 = vadd.f32 %v2194_v54, %v2131_v0  ;;  %v1730_v41 = vadd.f32 %v1729_v15, %v1633_v13  ;;  %v1745_v55 = vadd.f32 %v1712_v2, %v1648_v38  ;;  %v1841_v52 = vadd.f32 %v1808_v45, %v1744_v60  ;;  %v4212_v13 = vld [vmem:[#allocation40_spill] sm:$0xff] }
 0x30e   : > { %v1906_v10 = vsel %vm827_vm4, %v1904_v44, %v1860_v17  ;;  %v1923_v3 = vsel %vm827_vm4, %v1860_v17, %v4211_v33  ;;  %v2002_v14 = vsel %vm987_vm3, %v1999_v16, %v2001_v57  ;;  %v2100_v16 = vsel %vm1151_vm0, %v2098_v32, %v2054_v28 }
 0x30f   : > { %v2248_v20 = vadd.f32 %v3611_v56, %v2228_v18  ;;  %v1827_v26 = vadd.f32 %v3564_v48, %v1730_v41  ;;  %v1842_v34 = vadd.f32 %v1826_v40, %v1745_v55  ;;  %v1938_v22 = vadd.f32 %v1905_v47, %v1841_v52 }
 0x310   : > { %v4213_v48 = vrot.slane %v4212_v13, 2  ;;  %v2117_v9 = vsel %vm1151_vm0, %v2054_v28, %v4216_v43  ;;  %v2196_v30 = vsel %vm1311_vm5, %v2193_v7, %v2195_v63  ;;  %v4218_v27 = vrot.slane %v4217_v8, 3 }
 0x311   : > { %2265 = vst.msk [vmem:[%s3620_s25 + $0x68] sm:$0xff] %vm2251_vm8, %v2248_v20  ;;  %v1924_v5 = vadd.f32 %v1923_v3, %v1827_v26  ;;  %v1939_v50 = vadd.f32 %v1906_v10, %v1842_v34  ;;  %v2035_v51 = vadd.f32 %v2002_v14, %v1938_v22 }
 0x312   : > { %v2020_v11 = vsel %vm987_vm3, %v2001_v57, %v4213_v48  ;;  %v2214_v37 = vsel %vm1311_vm5, %v2195_v63, %v4218_v27 }
 0x313   : > { %v2021_v21 = vadd.f32 %v4214_v53, %v1924_v5  ;;  %v2036_v36 = vadd.f32 %v2020_v11, %v1939_v50  ;;  %v2132_v29 = vadd.f32 %v2099_v31, %v2035_v51 }
 0x315   : > { %v2118_v25 = vadd.f32 %v2117_v9, %v2021_v21  ;;  %v2133_v49 = vadd.f32 %v2100_v16, %v2036_v36  ;;  %v2229_v35 = vadd.f32 %v2196_v30, %v2132_v29 }
 0x317   : > { %v2215_v60 = vadd.f32 %v4219_v4, %v2118_v25  ;;  %v2230_v44 = vadd.f32 %v2214_v37, %v2133_v49  ;;  %v2249_v39 = vadd.f32 %v3611_v56, %v2229_v35 }
 0x319   : > { %v2235_v42 = vadd.f32 %v3611_v56, %v2215_v60  ;;  %v2250_v12 = vadd.f32 %v3611_v56, %v2230_v44  ;;  %2266 = vst.msk [vmem:[%s3620_s25 + $0x70] sm:$0xff] %vm2251_vm8, %v2249_v39 }
 0x31b   : > { %2252 = vst.msk [vmem:[%s3620_s25] sm:$0xff] %vm2251_vm8, %v2235_v42 }
 0x31c   : > { %2267 = vst.msk [vmem:[%s3620_s25 + $0x78] sm:$0xff] %vm2251_vm8, %v2250_v12 }
 0x31d PF: > { %s16_s21 = sadd.s32 1, %s2484_s21  }
 0x31e   : > { %p13_p4 = scmp.ge.s32.totalorder %s16_s21, 4  }
 0x320   :  { %15 = sbr.rel (!%p13_p4) target bundleno = 1 (0x1), region = 77 }

</bundles_post_ra>
